<compile_context>
chip_gen: v5e
topology: v5e:2x2
jax: 0.10.0
libtpu: 0.0.40
codegen_flags: <defaults>
</compile_context>

<pallas_src>
import functools

import jax
import jax.numpy as jnp
import numpy as np
from jax.experimental import pallas as pl
from jax.experimental.pallas import tpu as pltpu

_LANE = 128


def _round_up(x, m):
    return ((x + m - 1) // m) * m


def _vmem_budget_bytes():
    """~85% of this core's VMEM (128 MiB on v5e/v6e, 64 MiB per TC on v7x)."""
    try:
        cap = int(pltpu.get_tpu_info().vmem_capacity_bytes)
    except Exception:
        cap = 64 * 1024 * 1024          # conservative (v7x-sized) fallback
    return max(32 * 1024 * 1024, int(0.85 * cap))


def _pick_block_batch(n, slab_bytes, budget):
    """Batch elements per grid step: large enough to amortize per-step
    overhead (~0.35 us), small enough to double-buffer in+out within the VMEM
    budget, and leaving a grid of >= 2 steps when N >= 2 so both v7x
    TensorCores stay busy."""
    target = 4 << 20                                        # ~4 MiB input block
    by_vmem = max(1, (budget - (2 << 20)) // (5 * max(1, slab_bytes)))
    max_bt = max(1, min(n, target // max(1, slab_bytes), by_vmem))
    best = 1
    for bt in range(1, n + 1):
        if n % bt or bt > max_bt:
            continue
        if n >= 2 and n // bt < 2:      # keep >= 2 grid steps (megacore)
            continue
        best = bt
    return best


def _excite(pooled, w1, b1row, w2, b2row):
    """Tiny SE MLP in exact f32 on the VPU (broadcast-multiply + reduce).

    pooled: (B, C) f32; w1: (Hd, C); w2: (C, Hd); b1row: (1, Hd); b2row: (1, C)
    returns sigmoid scales (B, C) f32.
    """
    h = jnp.sum(pooled[:, None, :] * w1[None, :, :], axis=-1) + b1row   # (B, Hd)
    h = jnp.maximum(h, 0.0)
    s = jnp.sum(h[:, None, :] * w2[None, :, :], axis=-1) + b2row        # (B, C)
    return jax.nn.sigmoid(s)


# --------------------------------------------------------------------------
# Fused path: pool + MLP + scale in one pass per (Bt, C, HWp) slab.
# --------------------------------------------------------------------------
def _se_fused_kernel(inv_hw, src_ref, w1_ref, b1_ref, w2_ref, b2_ref, o_ref):
    # src_ref : (Bt, C, HWp)  spatial axis last (lane-dense, zero-padded)
    # w1_ref  : (Hd, C)   fc1 weight (PyTorch layout, f32)
    # b1_ref  : (1, Hd)
    # w2_ref  : (C, Hd)   fc2 weight (PyTorch layout, f32)
    # b2_ref  : (1, C)
    x = src_ref[...]
    # Squeeze: pool over the lane axis, accumulating in f32 (zero padding
    # contributes nothing; divide by the true HW).  No full-slab f32 temp.
    pooled = jnp.sum(x, axis=-1, dtype=jnp.float32) * inv_hw            # (Bt, C)
    # Excitation (tiny, exact f32).
    s = _excite(pooled, w1_ref[...], b1_ref[...], w2_ref[...], b2_ref[...])
    # Scale in the input dtype (for bf16 inputs this halves VALU/vst work).
    o_ref[...] = (x * s.astype(x.dtype)[:, :, None]).astype(o_ref.dtype)


# --------------------------------------------------------------------------
# Two-pass fallback: lane-tiled pool (+ MLP in finalize), then lane-tiled scale.
# --------------------------------------------------------------------------
def _se_pool_kernel(inv_hw, src_ref, w1_ref, b1_ref, w2_ref, b2_ref,
                    s_ref, acc_ref):
    # src_ref : (1, C, THW) ; s_ref : (1, C, 1) f32 ; acc_ref : VMEM (1, C) f32
    t = pl.program_id(1)

    @pl.when(t == 0)
    def _():
        acc_ref[...] = jnp.zeros_like(acc_ref)

    acc_ref[...] += jnp.sum(src_ref[...], axis=-1, dtype=jnp.float32)

    @pl.when(t == pl.num_programs(1) - 1)
    def _():
        pooled = acc_ref[...] * inv_hw                                   # (1, C)
        s = _excite(pooled, w1_ref[...], b1_ref[...], w2_ref[...], b2_ref[...])
        s_ref[...] = s[:, :, None]


def _se_scale_kernel(src_ref, s_ref, o_ref):
    # src_ref : (1, C, THW) ; s_ref : (1, C, 1) f32
    x = src_ref[...]
    o_ref[...] = (x * s_ref[...].astype(x.dtype)).astype(o_ref.dtype)


# --------------------------------------------------------------------------
# Wrapper
# --------------------------------------------------------------------------
def squeeze_excitation(src, w1, b1, w2, b2, *, force_two_pass=False):
    """src: (N, C, H, W); w1: (Hd, C); b1: (Hd,); w2: (C, Hd); b2: (C,)."""
    N, C, H, W = src.shape
    HW = H * W
    Hd = w1.shape[0]
    itemsize = src.dtype.itemsize
    inv_hw = 1.0 / HW

    # Tiny, grid-invariant MLP parameters (kept in f32, PyTorch layouts).
    w1f = w1.astype(jnp.float32)                       # (Hd, C)
    b1r = b1.reshape(1, Hd).astype(jnp.float32)
    w2f = w2.astype(jnp.float32)                       # (C, Hd)
    b2r = b2.reshape(1, C).astype(jnp.float32)
    weight_bytes = 4 * (2 * C * Hd + Hd + C)

    budget = _vmem_budget_bytes()
    hw128 = _round_up(HW, _LANE)                       # lane-dense spatial axis
    slab_bytes = C * hw128 * itemsize                  # one batch element

    # Fused single-pass path is viable iff one padded slab can be
    # double-buffered in and out with headroom inside the VMEM budget.
    fused_ok = (not force_two_pass) and \
        (5 * slab_bytes + weight_bytes + (2 << 20) <= budget)

    # NCHW -> (N, C, HW): pure flatten of contiguous spatial dims.
    x = src.reshape(N, C, HW)

    if fused_ok:
        bt = _pick_block_batch(N, slab_bytes, budget)
        hw_pad = hw128
        if hw_pad != HW:
            x = jnp.pad(x, ((0, 0), (0, 0), (0, hw_pad - HW)))
        out_flat = pl.pallas_call(
            functools.partial(_se_fused_kernel, inv_hw),
            out_shape=jax.ShapeDtypeStruct((N, C, hw_pad), src.dtype),
            grid=(N // bt,),
            in_specs=[
                pl.BlockSpec((bt, C, hw_pad), lambda n: (n, 0, 0)),
                pl.BlockSpec((Hd, C), lambda n: (0, 0)),
                pl.BlockSpec((1, Hd), lambda n: (0, 0)),
                pl.BlockSpec((C, Hd), lambda n: (0, 0)),
                pl.BlockSpec((1, C), lambda n: (0, 0)),
            ],
            out_specs=pl.BlockSpec((bt, C, hw_pad), lambda n: (n, 0, 0)),
            compiler_params=pltpu.CompilerParams(
                dimension_semantics=("parallel",),
                vmem_limit_bytes=budget),
        )(x, w1f, b1r, w2f, b2r)
    else:
        # Two-pass fallback: lane tiles of the spatial axis (~2 MiB each,
        # always a multiple of 128 lanes).
        tile_target = (32 << 10) if force_two_pass else (2 << 20)
        thw = max(_LANE, min(hw128,
                             (tile_target // max(1, C * itemsize)) // _LANE * _LANE))
        hw_pad = _round_up(HW, thw)
        if hw_pad != HW:
            x = jnp.pad(x, ((0, 0), (0, 0), (0, hw_pad - HW)))
        n_hw = hw_pad // thw

        # Pass 1: pool over HW tiles, MLP in the finalize step -> (N, C, 1).
        s = pl.pallas_call(
            functools.partial(_se_pool_kernel, inv_hw),
            out_shape=jax.ShapeDtypeStruct((N, C, 1), jnp.float32),
            grid=(N, n_hw),
            in_specs=[
                pl.BlockSpec((1, C, thw), lambda n, t: (n, 0, t)),
                pl.BlockSpec((Hd, C), lambda n, t: (0, 0)),
                pl.BlockSpec((1, Hd), lambda n, t: (0, 0)),
                pl.BlockSpec((C, Hd), lambda n, t: (0, 0)),
                pl.BlockSpec((1, C), lambda n, t: (0, 0)),
            ],
            out_specs=pl.BlockSpec((1, C, 1), lambda n, t: (n, 0, 0)),
            scratch_shapes=[pltpu.VMEM((1, C), jnp.float32)],
            compiler_params=pltpu.CompilerParams(
                dimension_semantics=("parallel", "arbitrary"),
                vmem_limit_bytes=budget),
        )(x, w1f, b1r, w2f, b2r)

        # Pass 2: re-stream HW tiles and scale (both grid axes independent,
        # so the HW axis also shards across v7x TensorCores when N == 1).
        out_flat = pl.pallas_call(
            _se_scale_kernel,
            out_shape=jax.ShapeDtypeStruct((N, C, hw_pad), src.dtype),
            grid=(N, n_hw),
            in_specs=[
                pl.BlockSpec((1, C, thw), lambda n, t: (n, 0, t)),
                pl.BlockSpec((1, C, 1), lambda n, t: (n, 0, 0)),
            ],
            out_specs=pl.BlockSpec((1, C, thw), lambda n, t: (n, 0, t)),
            compiler_params=pltpu.CompilerParams(
                dimension_semantics=("parallel", "parallel"),
                vmem_limit_bytes=budget),
        )(x, s)

    if hw_pad != HW:
        out_flat = out_flat[:, :, :HW]
    return out_flat.reshape(N, C, H, W)


def _reference(src, w1, b1, w2, b2):
    """Pure-JAX reference matching the PyTorch forward (exact f32 math)."""
    pooled = jnp.mean(src.astype(jnp.float32), axis=(2, 3))              # (N, C)
    h = jax.nn.relu(jnp.sum(pooled[:, None, :] * w1[None], axis=-1) + b1)
    s = jax.nn.sigmoid(jnp.sum(h[:, None, :] * w2[None], axis=-1) + b2)  # (N, C)
    return src * s[:, :, None, None].astype(src.dtype)


if __name__ == "__main__":
    # Small shapes consistent with the module: reduction_ratio=16 requires
    # in_channels to be a multiple of 16, so use C=64 (hidden = 4).
    N, C, H, W = 2, 64, 16, 16
    REDUCTION = 16
    Hd = C // REDUCTION

    key = jax.random.PRNGKey(0)
    k_src, k_w1, k_b1, k_w2, k_b2 = jax.random.split(key, 5)
    src = jax.random.normal(k_src, (N, C, H, W), dtype=jnp.float32)
    w1 = 0.2 * jax.random.normal(k_w1, (Hd, C), dtype=jnp.float32)  # Linear(C -> Hd)
    b1 = 0.1 * jax.random.normal(k_b1, (Hd,), dtype=jnp.float32)
    w2 = 0.2 * jax.random.normal(k_w2, (C, Hd), dtype=jnp.float32)  # Linear(Hd -> C)
    b2 = 0.1 * jax.random.normal(k_b2, (C,), dtype=jnp.float32)

    ref = _reference(src, w1, b1, w2, b2)

    # Fused single-pass path (what this shape selects naturally).
    out_fused = jax.block_until_ready(squeeze_excitation(src, w1, b1, w2, b2))
    np.testing.assert_allclose(np.asarray(out_fused), np.asarray(ref),
                               rtol=1e-5, atol=1e-5)

    # Two-pass fallback path (forced, with small HW tiles so the tile-wise
    # pool accumulation is actually exercised).
    out_two = jax.block_until_ready(
        squeeze_excitation(src, w1, b1, w2, b2, force_two_pass=True))
    np.testing.assert_allclose(np.asarray(out_two), np.asarray(ref),
                               rtol=1e-5, atol=1e-5)

    print("KERNEL_OK")
</pallas_src>

<mosaic_0001>
module attributes {stable_mosaic.version = 11 : i64} {
  func.func @_se_fused_kernel(%arg0: i32, %arg1: memref<1x64x256xf32, #tpu.memory_space<vmem>>, %arg2: memref<4x64xf32, #tpu.memory_space<vmem>>, %arg3: memref<1x4xf32, #tpu.memory_space<vmem>>, %arg4: memref<64x4xf32, #tpu.memory_space<vmem>>, %arg5: memref<1x64xf32, #tpu.memory_space<vmem>>, %arg6: memref<1x64x256xf32, #tpu.memory_space<vmem>>) attributes {dimension_semantics = [#tpu.dimension_semantics<parallel>], iteration_bounds = array<i64: 2>, scalar_prefetch = 0 : i64, scratch_operands = 0 : i64, tpu.core_type = #tpu.core_type<tc>, window_params = [{transform_indices = @transform_0, window_bounds = array<i64: 1, 64, 256>}, {pipeline_mode = #tpu.pipeline_mode<synchronous>, transform_indices = @transform_1, window_bounds = array<i64: 4, 64>}, {pipeline_mode = #tpu.pipeline_mode<synchronous>, transform_indices = @transform_2, window_bounds = array<i64: 1, 4>}, {pipeline_mode = #tpu.pipeline_mode<synchronous>, transform_indices = @transform_3, window_bounds = array<i64: 64, 4>}, {pipeline_mode = #tpu.pipeline_mode<synchronous>, transform_indices = @transform_4, window_bounds = array<i64: 1, 64>}, {transform_indices = @transform_5, window_bounds = array<i64: 1, 64, 256>}]} {
    %c0 = arith.constant 0 : index
    %c0_0 = arith.constant 0 : index
    %c0_1 = arith.constant 0 : index
    %0 = vector.load %arg1[%c0, %c0_0, %c0_1] : memref<1x64x256xf32, #tpu.memory_space<vmem>>, vector<1x64x256xf32>
    %cst = arith.constant dense<0.000000e+00> : vector<1x64xf32>
    %1 = vector.multi_reduction <add>, %0, %cst [2] : vector<1x64x256xf32> to vector<1x64xf32>
    %cst_2 = arith.constant 3.906250e-03 : f32
    %2 = vector.broadcast %cst_2 : f32 to vector<1x64xf32>
    %3 = arith.mulf %1, %2 : vector<1x64xf32>
    %c0_3 = arith.constant 0 : index
    %c0_4 = arith.constant 0 : index
    %4 = vector.load %arg2[%c0_3, %c0_4] : memref<4x64xf32, #tpu.memory_space<vmem>>, vector<4x64xf32>
    %c0_5 = arith.constant 0 : index
    %c0_6 = arith.constant 0 : index
    %5 = vector.load %arg3[%c0_5, %c0_6] : memref<1x4xf32, #tpu.memory_space<vmem>>, vector<1x4xf32>
    %c0_7 = arith.constant 0 : index
    %c0_8 = arith.constant 0 : index
    %6 = vector.load %arg4[%c0_7, %c0_8] : memref<64x4xf32, #tpu.memory_space<vmem>>, vector<64x4xf32>
    %c0_9 = arith.constant 0 : index
    %c0_10 = arith.constant 0 : index
    %7 = vector.load %arg5[%c0_9, %c0_10] : memref<1x64xf32, #tpu.memory_space<vmem>>, vector<1x64xf32>
    %8 = vector.shape_cast %3 : vector<1x64xf32> to vector<1x1x64xf32>
    %9 = vector.shape_cast %4 : vector<4x64xf32> to vector<1x4x64xf32>
    %10 = vector.broadcast %8 : vector<1x1x64xf32> to vector<1x4x64xf32>
    %11 = arith.mulf %10, %9 : vector<1x4x64xf32>
    %cst_11 = arith.constant dense<0.000000e+00> : vector<1x4xf32>
    %12 = vector.multi_reduction <add>, %11, %cst_11 [2] : vector<1x4x64xf32> to vector<1x4xf32>
    %13 = arith.addf %12, %5 : vector<1x4xf32>
    %cst_12 = arith.constant 0.000000e+00 : f32
    %14 = vector.broadcast %cst_12 : f32 to vector<1x4xf32>
    %15 = arith.maximumf %13, %14 : vector<1x4xf32>
    %16 = vector.shape_cast %15 : vector<1x4xf32> to vector<1x1x4xf32>
    %17 = vector.shape_cast %6 : vector<64x4xf32> to vector<1x64x4xf32>
    %18 = vector.broadcast %16 : vector<1x1x4xf32> to vector<1x64x4xf32>
    %19 = arith.mulf %18, %17 : vector<1x64x4xf32>
    %cst_13 = arith.constant dense<0.000000e+00> : vector<1x64xf32>
    %20 = vector.multi_reduction <add>, %19, %cst_13 [2] : vector<1x64x4xf32> to vector<1x64xf32>
    %21 = arith.addf %20, %7 : vector<1x64xf32>
    %22 = arith.negf %21 : vector<1x64xf32>
    %23 = math.exp %22 : vector<1x64xf32>
    %cst_14 = arith.constant 1.000000e+00 : f32
    %24 = vector.broadcast %cst_14 : f32 to vector<1x64xf32>
    %25 = arith.addf %24, %23 : vector<1x64xf32>
    %26 = arith.divf %24, %25 : vector<1x64xf32>
    %27 = vector.shape_cast %26 : vector<1x64xf32> to vector<1x64x1xf32>
    %28 = vector.broadcast %27 : vector<1x64x1xf32> to vector<1x64x256xf32>
    %29 = arith.mulf %0, %28 : vector<1x64x256xf32>
    %c0_15 = arith.constant 0 : index
    %c0_16 = arith.constant 0 : index
    %c0_17 = arith.constant 0 : index
    %30 = vector.load %arg6[%c0_15, %c0_16, %c0_17] : memref<1x64x256xf32, #tpu.memory_space<vmem>>, vector<1x64x256xf32>
    tpu.vector_store %arg6[%c0_15, %c0_16, %c0_17], %29 {strides = array<i32>} : memref<1x64x256xf32, #tpu.memory_space<vmem>>, vector<1x64x256xf32>,
    return
  }
  func.func @transform_0(%arg0: i32) -> (i32, i32, i32) {
    %c0_i32 = arith.constant 0 : i32
    %c0_i32_0 = arith.constant 0 : i32
    %c0_i32_1 = arith.constant 0 : i32
    return %arg0, %c0_i32, %c0_i32_0 : i32, i32, i32
  }
  func.func @transform_1(%arg0: i32) -> (i32, i32) {
    %c0_i32 = arith.constant 0 : i32
    %c0_i32_0 = arith.constant 0 : i32
    %c0_i32_1 = arith.constant 0 : i32
    return %c0_i32, %c0_i32_0 : i32, i32
  }
  func.func @transform_2(%arg0: i32) -> (i32, i32) {
    %c0_i32 = arith.constant 0 : i32
    %c0_i32_0 = arith.constant 0 : i32
    %c0_i32_1 = arith.constant 0 : i32
    return %c0_i32, %c0_i32_0 : i32, i32
  }
  func.func @transform_3(%arg0: i32) -> (i32, i32) {
    %c0_i32 = arith.constant 0 : i32
    %c0_i32_0 = arith.constant 0 : i32
    %c0_i32_1 = arith.constant 0 : i32
    return %c0_i32, %c0_i32_0 : i32, i32
  }
  func.func @transform_4(%arg0: i32) -> (i32, i32) {
    %c0_i32 = arith.constant 0 : i32
    %c0_i32_0 = arith.constant 0 : i32
    %c0_i32_1 = arith.constant 0 : i32
    return %c0_i32, %c0_i32_0 : i32, i32
  }
  func.func @transform_5(%arg0: i32) -> (i32, i32, i32) {
    %c0_i32 = arith.constant 0 : i32
    %c0_i32_0 = arith.constant 0 : i32
    %c0_i32_1 = arith.constant 0 : i32
    return %arg0, %c0_i32, %c0_i32_0 : i32, i32, i32
  }
}

</mosaic_0001>

<bundles_post_ra>
// kernel: tpu_custom_call.1
= control target key start
LH: loop header
LB: loop body
LE: loop exit
PB: predicated region body
PF: predicated region fallthrough
CT: control target
= control target key end

     0   :  { %10 = vsyncpa [#allocation3], 0  ;;  %s3378_s0 = inlined_call_operand.hbm [shape: f32[2,64,256], index: 0, kind: input, shape index: {}]   ;;  %s3379_s1 = inlined_call_operand.vmem [shape: f32[4,64], index: 1, kind: input, shape index: {}]   ;;  %s3380_s2 = inlined_call_operand.vmem [shape: f32[1,4], index: 2, kind: input, shape index: {}]   ;;  %s3381_s3 = inlined_call_operand.vmem [shape: f32[64,4], index: 3, kind: input, shape index: {}]   ;;  %s3382_s4 = inlined_call_operand.vmem [shape: f32[1,64], index: 4, kind: input, shape index: {}]   ;;  %s3383_s5 = inlined_call_operand.hbm [shape: f32[2,64,256], index: 5, kind: output, shape index: {}]  }
   0x1   :  { %12 = vsyncpa [#allocation3 + $0x1], 0 }
   0x2   :  { %13 = vsyncpa [#allocation4], 0 }
   0x3   :  { %15 = vsyncpa [#allocation4 + $0x1], 0  ;;  %s2477_s18 = smov 0   ;;  %s2479_s19 = smov 0  }
   0x4   :  { %s2481_s20 = smov 0   ;;  %s2483_s21 = smov 0  }
   0x5 LB: > { %s2498_s22 = sadd.s32 4294967295, %s2440_s21   ;;  %s2167_s23 = sadd.s32 4294967294, %s2440_s21   ;;  %s2440_s21 = sphi %s2483_s21, %s3393_s21   ;;  %s2436_s20 = sphi %s2481_s20, %s3392_s20   ;;  %s2432_s19 = sphi %s2479_s19, %s3391_s19   ;;  %s2428_s18 = sphi %s2477_s18, %s3390_s18  }
   0x6   : > { %s2502_s24 = sadd.s32 1, %s2440_s21   ;;  %s28_s25 = sadd.s32 1, %s2436_s20 }
   0x7   : > { %s25_s26 = ssub.s32 %s2440_s21, %s2502_s24  ;;  %p35_p0 = scmp.ne.s32.totalorder %s2436_s20, %s2432_s19 }
   0x8   : > { %p26_p1 = scmp.eq.s32.totalorder %s25_s26, 0  ;;  %p36_p2 = scmp.eq.s32.totalorder %s2440_s21, 0 }
   0x9   : > { %p41_p3 = scmp.ne.s32.totalorder %s2432_s19, %s2428_s18  ;;  %p42_p4 = scmp.eq.s32.totalorder %s2498_s22, 0 }
   0xa   : > { %s2514_s27 = scalar_select %p26_p1, %s2436_s20, %s28_s25  }
   0xb   : > { %p2516_p5 = por %p36_p2, %p35_p0  ;;  %p2520_p6 = por %p42_p4, %p41_p3 }
   0xc   : > { %p149_p7 = scmp.eq.s32.totalorder %s2498_s22, 1  ;;  %p155_p8 = scmp.eq.s32.totalorder %s2167_s23, 1 }
   0xd   : > { %p2203_p10 = scmp.lt.s32.totalorder %s2440_s21, 2  ;;  %s187_s7 = sand.u32 1, %s2436_s20  }
   0xe   : > { %p2527_p11 = por %p149_p7, %p35_p0  ;;  %p2531_p12 = por %p155_p8, %p41_p3 }
   0xf   : > { %s2189_s8 = sshll.u32 %s2440_s21, 7  ;;  %s2170_s9 = sshll.u32 %s187_s7, 7 }
  0x10   : > { %s196_s12 = scalar_lea.hbm %s3378_s0, %s2189_s8  ;;  %s191_s14 = scalar_lea.vmem [#allocation2], %s2170_s9 }
  0x11   : > { %s197_s13 = sshll.u32 %s196_s12, 4  ;;  %s199_s15 = sshll.u32 %s191_s14, 4  ;;  %s198_s13 = int_to_ptr.hbm [resolvable:$true] %s197_s13  ;;  %s200_s15 = int_to_ptr.vmem [resolvable:$true] %s199_s15 }
  0x12   : > { %p2542_p13 = pnand %p2203_p10, %p2516_p5  ;;  %p2173_p0 = scmp.ge.s32.totalorder %s2440_s21, 1 }
  0x13   : > { %p207_p1 = scmp.lt.s32.totalorder %s2440_s21, 3  ;;  %s188_s17 = scalar_lea.sflag [#allocation3], %s187_s7 }
  0x14   : > { %s2344_s23 = sshra.s32 %s198_s13, 4  ;;  %p2348_p3 = pneg %p2542_p13  ;;  %s2345_s23 = int_to_ptr.hbm [resolvable:$true] %s2344_s23 }
  0x15   : > { %s2346_s25 = scalar_lea.hbm %s2345_s23, 128  ;;  %s2351_s28 = scalar_lea.hbm %s3378_s0, 256 }
  0x16   : > { %p2347_p2 = scmp.ne.s32.totalorder %s2345_s23, %s2346_s25  ;;  %p2352_p5 = scmp.lt.s32.totalorder %s2345_s23, %s3378_s0 }
  0x17   : > { %p2353_p8 = scmp.lt.s32.totalorder %s2351_s28, %s2346_s25 }
  0x18   : > { %p2349_p4 = pnand %p2348_p3, %p2347_p2 }
  0x19   : > { %p2354_p10 = por %p2353_p8, %p2352_p5 }
  0x1a   : > { %p2350_p7 = pneg %p2349_p4 }
  0x1c   : > { %p2355_p9 = pnand %p2354_p10, %p2350_p7 }
  0x1e   : > { %2358 = shalt.err (!%p2355_p9)
}
  0x1f   : > { %s2442_s7 = smov 256   ;;  %s2443_s11 = smov 16  }
  0x20   : > { %2198 = dma.hbm_to_vmem [thread:$0]  (!%p2542_p13), %s198_s13, 2048, %s200_s15, %s188_s17, %s2442_s7, %s2442_s7, %s2443_s11  }
  0x21   : > { %p208_p2 = pnand %p2173_p0, %p207_p1 }
  0x22   : > { %s2563_s12 = sand.u32 (!%p208_p2), 1, %s2432_s19  }
  0x23   : > { %211 = sbr.rel (%p208_p2) target bundleno = 1265 (0x4f1), region = 40  ;;  %s2174_s14 = sshll.u32 (!%p208_p2), %s2563_s12, 7 }
  0x24   : > { %s214_s23 = scalar_lea.sflag (!%p208_p2), [#allocation3], %s2563_s12  ;;  %s2569_s25 = scalar_lea.vmem (!%p208_p2), [#allocation2], %s2174_s14 }
  0x28   : > { %2419 = dma.done.wait (%p2520_p6), %s214_s23, 2048  }
  0x29   : > { %2421 = vsyncadd (%p2520_p6), %s214_s23, 4294965248  ;;  %v306_v0 = vlaneseq  ;;  %v253_v3 = vld [vmem:[%s2569_s25 + $0x40] sm:$0xff]  ;;  %v254_v4 = vld [vmem:[%s2569_s25 + $0x48] sm:$0xff]  ;;  %v2444_v44 = vmov 0   ;;  %vm698_vm0 = vcmask 130112   ;;  %vm702_vm1 = vcmask 195712  }
  0x2a   : > { %v249_v5 = vld [vmem:[%s2569_s25 + $0x20] sm:$0xff]  ;;  %v273_v6 = vadd.f32 %v254_v4, %v253_v3  ;;  %v250_v7 = vld [vmem:[%s2569_s25 + $0x28] sm:$0xff]  ;;  %v255_v12 = vld [vmem:[%s2569_s25 + $0x50] sm:$0xff]  ;;  %vm706_vm2 = vcmask 261312   ;;  %vm710_vm3 = vcmask 326912   ;;  %vm714_vm4 = vcmask 392512  }
  0x2b   : > { %v2576_v1 = vshrl.u32 %v306_v0, 7  ;;  %v245_v8 = vld [vmem:[%s2569_s25] sm:$0xff]  ;;  %v246_v9 = vld [vmem:[%s2569_s25 + $0x8] sm:$0xff]  ;;  %v267_v10 = vadd.f32 %v250_v7, %v249_v5  ;;  %v256_v14 = vld [vmem:[%s2569_s25 + $0x58] sm:$0xff]  ;;  %vm718_vm5 = vcmask 458112   ;;  %vm722_vm6 = vcmask 523712  }
  0x2c   : > { %v261_v11 = vadd.f32 %v246_v9, %v245_v8  ;;  %274 = vadd.xlane.f32.xlu2 %v273_v6  ;;  %v251_v15 = vld [vmem:[%s2569_s25 + $0x30] sm:$0xff]  ;;  %v252_v16 = vld [vmem:[%s2569_s25 + $0x38] sm:$0xff]  ;;  %v276_v19 = vadd.f32 %v256_v14, %v255_v12  ;;  %v257_v24 = vld [vmem:[%s2569_s25 + $0x60] sm:$0xff]  ;;  %vm769_vm7 = vcmask 1041409   ;;  %vm771_vm8 = vcmask 1042434   ;;  %s3312_s10 = scalar_lea.vmem [#allocation5], %s2174_s14 }
  0x2d   : > { %2242 = vset.pattern.permute.xlu2 %v2576_v1  ;;  %v2580_v2 = vadd.s32 8, %v2576_v1  ;;  %v2591_v13 = vadd.s32 16, %v2576_v1  ;;  %268 = vadd.xlane.f32.xlu1 %v267_v10  ;;  %v247_v17 = vld [vmem:[%s2569_s25 + $0x10] sm:$0xff]  ;;  %v248_v18 = vld [vmem:[%s2569_s25 + $0x18] sm:$0xff]  ;;  %v270_v20 = vadd.f32 %v252_v16, %v251_v15  ;;  %v258_v25 = vld [vmem:[%s2569_s25 + $0x68] sm:$0xff]  ;;  %v2607_v30 = vadd.s32 24, %v2576_v1 }
  0x2e   : > { %262 = vadd.xlane.f32.xlu0 %v261_v11  ;;  %v264_v21 = vadd.f32 %v248_v18, %v247_v17  ;;  %v259_v22 = vld [vmem:[%s2569_s25 + $0x70] sm:$0xff]  ;;  %v260_v23 = vld [vmem:[%s2569_s25 + $0x78] sm:$0xff]  ;;  %v279_v27 = vadd.f32 %v258_v25, %v257_v24  ;;  %v293_v28 = vld [vmem:[%s3379_s1] sm:$0xf]  ;;  %v2612_v31 = vadd.s32 40, %v2576_v1  ;;  %v2616_v33 = vadd.s32 32, %v2576_v1 }
  0x2f   : > { %2243 = vset.pattern.permute.xlu0 %v2580_v2  ;;  %2244 = vset.pattern.permute.xlu1 %v2591_v13  ;;  %v282_v26 = vadd.f32 %v260_v23, %v259_v22  ;;  %v305_v29 = vperm.slane %v293_v28, 0  ;;  %v354_v32 = vperm.slane %v293_v28, 1  ;;  %v2621_v34 = vadd.s32 56, %v2576_v1  ;;  %s2190_s14 = sshll.u32 %s2498_s22, 7  ;;  %s2091_s29 = sshll.u32 %s3312_s10, 4  ;;  %s2092_s29 = int_to_ptr.vmem [resolvable:$true] %s2091_s29 }
  0x30   : > { %v2625_v35 = vadd.s32 48, %v2576_v1  ;;  %v403_v36 = vperm.slane %v293_v28, 2  ;;  %v2635_v37 = vperm.slane %v293_v28, 3  ;;  %vm773_vm9 = vcmask 1043459   ;;  %s2090_s23 = scalar_lea.hbm %s3383_s5, %s2190_s14  ;;  %s2079_s22 = scalar_lea.sflag [#allocation4], %s2563_s12 }
  0x31   : > { %vm776_vm10 = vcmask 519168   ;;  %vm1698_vm11 = vcmask 1044484   ;;  %vm1700_vm12 = vcmask 1045509   ;;  %vm1702_vm13 = vcmask 1046534   ;;  %s2093_s13 = sshll.u32 %s2090_s23, 4  ;;  %s2394_s8 = scalar_lea.hbm %s3383_s5, 256  ;;  %s2094_s13 = int_to_ptr.hbm [resolvable:$true] %s2093_s13 }
  0x32   : > { %vm1704_vm14 = vcmask 1047559   ;;  %vm1763_vm15 = vcmask 31744   ;;  %s2388_s15 = sshra.s32 %s2094_s13, 4  ;;  %s2389_s15 = int_to_ptr.hbm [resolvable:$true] %s2388_s15 }
  0x33   : > { %s2390_s16 = scalar_lea.hbm %s2389_s15, 128  ;;  %p2395_p0 = scmp.lt.s32.totalorder %s2389_s15, %s3383_s5 }
  0x34   : > { %277 = vadd.xlane.f32.xlu2 %v276_v19  ;;  %p2391_p6 = scmp.ne.s32.totalorder %s2389_s15, %s2390_s16  ;;  %p2396_p1 = scmp.lt.s32.totalorder %s2394_s8, %s2390_s16 }
  0x35   : > { %271 = vadd.xlane.f32.xlu1 %v270_v20 }
  0x36   : > { %265 = vadd.xlane.f32.xlu0 %v264_v21  ;;  %p2392_p9 = pnand %p2391_p6, %p2527_p11  ;;  %p2397_p3 = por %p2396_p1, %p2395_p0 }
  0x38   : > { %p2393_p13 = pneg %p2392_p9 }
  0x3a   : > { %p2398_p4 = pnand %p2397_p3, %p2393_p13 }
  0x3d   : > { %283 = vadd.xlane.f32.xlu1 %v282_v26 }
  0x3e   : > { %280 = vadd.xlane.f32.xlu0 %v279_v27 }
  0x4c   : > { %310 = vperm.xlu2 %2242, %v305_v29  }
  0x52   : > { %316 = vperm.xlu0 %2243, %v305_v29  }
  0x54   : > { %2245 = vset.pattern.permute.xlu2 %v2607_v30 }
  0x56   : > { %322 = vperm.xlu1 %2244, %v305_v29  }
  0x5a   : > { %2250 = vset.pattern.permute.xlu0 %v2576_v1 }
  0x5c   : > { %328 = vperm.xlu2 %2245, %v305_v29  }
  0x5e   : > { %2247 = vset.pattern.permute.xlu1 %v2612_v31 }
  0x62   : > { %359 = vperm.xlu0 %2250, %v354_v32  }
  0x64   : > { %2246 = vset.pattern.permute.xlu2 %v2616_v33 }
  0x66   : > { %340 = vperm.xlu1 %2247, %v305_v29  }
  0x6a   : > { %2255 = vset.pattern.permute.xlu0 %v2612_v31 }
  0x6c   : > { %334 = vperm.xlu2 %2246, %v305_v29  }
  0x6e   : > { %2249 = vset.pattern.permute.xlu1 %v2621_v34 }
  0x72   : > { %389 = vperm.xlu0 %2255, %v354_v32  }
  0x74   : > { %2248 = vset.pattern.permute.xlu2 %v2625_v35 }
  0x76   : > { %352 = vperm.xlu1 %2249, %v305_v29  }
  0x7a   : > { %2260 = vset.pattern.permute.xlu0 %v2591_v13 }
  0x7c   : > { %346 = vperm.xlu2 %2248, %v305_v29  }
  0x7e   : > { %2252 = vset.pattern.permute.xlu1 %v2591_v13 }
  0x82   : > { %420 = vperm.xlu0 %2260, %v403_v36  }
  0x84   : > { %2251 = vset.pattern.permute.xlu2 %v2580_v2 }
  0x86   : > { %371 = vperm.xlu1 %2252, %v354_v32  }
  0x8a   : > { %2265 = vset.pattern.permute.xlu0 %v2621_v34 }
  0x8c   : > { %365 = vperm.xlu2 %2251, %v354_v32  }
  0x8e   : > { %2254 = vset.pattern.permute.xlu1 %v2616_v33 }
  0x92   : > { %450 = vperm.xlu0 %2265, %v403_v36  }
  0x94   : > { %2253 = vset.pattern.permute.xlu2 %v2607_v30 }
  0x96   : > { %383 = vperm.xlu1 %2254, %v354_v32  }
  0x9a   : > { %2270 = vset.pattern.permute.xlu0 %v2616_v33 }
  0x9c   : > { %377 = vperm.xlu2 %2253, %v354_v32  }
  0x9e   : > { %2257 = vset.pattern.permute.xlu1 %v2621_v34 }
  0x9f   : > { %v275_v39 = vpop.xlane.xlu2 %274 }
  0xa0   : > { %v269_v49 = vpop.xlane.xlu1 %268  ;;  %v2669_v62 = vmul.f32 0.00390625, %v275_v39 }
  0xa1   : > { %v263_v38 = vpop.xlane.xlu0 %262  ;;  %v287_v19 = vmul.f32 0.00390625, %v269_v49 }
  0xa2   : > { %481 = vperm.xlu0 %2270, %v2635_v37   ;;  %v285_v3 = vmul.f32 0.00390625, %v263_v38 }
  0xa4   : > { %2256 = vset.pattern.permute.xlu2 %v2625_v35 }
  0xa6   : > { %401 = vperm.xlu1 %2257, %v354_v32  }
  0xa7   : > { %v2641_v41 = vpop.xlane.xlu2 %277 }
  0xa8   : > { %v272_v52 = vpop.xlane.xlu1 %271  ;;  %v290_v15 = vmul.f32 0.00390625, %v2641_v41 }
  0xa9   : > { %v266_v40 = vpop.xlane.xlu0 %265  ;;  %v2674_v7 = vmul.f32 0.00390625, %v272_v52 }
  0xaa   : > { %2275 = vset.pattern.permute.xlu0 %v2444_v44  ;;  %v2646_v45 = vmul.f32 0.00390625, %v266_v40 }
  0xac   : > { %395 = vperm.xlu2 %2256, %v354_v32  }
  0xae   : > { %2259 = vset.pattern.permute.xlu1 %v2580_v2 }
  0xaf   : > { %v311_v43 = vpop.permute.xlu2 %310 }
  0xb0   : > { %v284_v55 = vpop.xlane.xlu1 %283  ;;  %v533_v6 = vmul.f32 %v311_v43, %v285_v3 }
  0xb1   : > { %v281_v42 = vpop.xlane.xlu0 %280  ;;  %v2678_v11 = vmul.f32 0.00390625, %v284_v55 }
  0xb2   : > { %v2653_v51 = vmul.f32 0.00390625, %v281_v42 }
  0xb4   : > { %2258 = vset.pattern.permute.xlu2 %v2576_v1 }
  0xb6   : > { %414 = vperm.xlu1 %2259, %v403_v36  }
  0xb7   : > { %v329_v48 = vpop.permute.xlu2 %328 }
  0xb8   : > { %v536_v9 = vmul.f32 %v329_v48, %v2674_v7 }
  0xbc   : > { %408 = vperm.xlu2 %2258, %v403_v36  }
  0xbe   : > { %2262 = vset.pattern.permute.xlu1 %v2616_v33 }
  0xc4   : > { %v317_v46 = vpop.permute.xlu0 %316  ;;  %2261 = vset.pattern.permute.xlu2 %v2607_v30 }
  0xc5   : > { %v534_v47 = vmul.f32 %v317_v46, %v2646_v45 }
  0xc6   : > { %432 = vperm.xlu1 %2262, %v403_v36   ;;  %v2650_v50 = vpop.permute.xlu2 %334 }
  0xc7   : > { %601 = vperm.xlu0 %2275, %v534_v47   ;;  %v537_v24 = vmul.f32 %v2650_v50, %v2669_v62 }
  0xc8   : > { %v323_v58 = vpop.permute.xlu1 %322 }
  0xc9   : > { %v535_v21 = vmul.f32 %v323_v58, %v287_v19 }
  0xcc   : > { %426 = vperm.xlu2 %2261, %v403_v36  }
  0xce   : > { %2264 = vset.pattern.permute.xlu1 %v2625_v35 }
  0xd4   : > { %2263 = vset.pattern.permute.xlu2 %v2612_v31  ;;  %v360_v5 = vpop.permute.xlu0 %359 }
  0xd5   : > { %v541_v22 = vmul.f32 %v360_v5, %v285_v3 }
  0xd6   : > { %444 = vperm.xlu1 %2264, %v403_v36   ;;  %v347_v53 = vpop.permute.xlu2 %346 }
  0xd7   : > { %v539_v54 = vmul.f32 %v347_v53, %v2653_v51 }
  0xd8   : > { %v341_v59 = vpop.permute.xlu1 %340 }
  0xd9   : > { %616 = vperm.xlu0 %2275, %v539_v54   ;;  %v538_v17 = vmul.f32 %v341_v59, %v290_v15 }
  0xdc   : > { %438 = vperm.xlu2 %2263, %v403_v36  }
  0xde   : > { %2267 = vset.pattern.permute.xlu1 %v2580_v2 }
  0xe4   : > { %2266 = vset.pattern.permute.xlu2 %v2576_v1  ;;  %v390_v10 = vpop.permute.xlu0 %389 }
  0xe5   : > { %v546_v40 = vmul.f32 %v390_v10, %v290_v15 }
  0xe6   : > { %463 = vperm.xlu1 %2267, %v2635_v37   ;;  %v366_v56 = vpop.permute.xlu2 %365 }
  0xe7   : > { %v542_v57 = vmul.f32 %v366_v56, %v2646_v45 }
  0xe8   : > { %v353_v60 = vpop.permute.xlu1 %352 }
  0xe9   : > { %625 = vperm.xlu0 %2275, %v542_v57   ;;  %v540_v27 = vmul.f32 %v353_v60, %v2678_v11 }
  0xec   : > { %457 = vperm.xlu2 %2266, %v2635_v37  }
  0xee   : > { %2269 = vset.pattern.permute.xlu1 %v2607_v30 }
  0xf4   : > { %2268 = vset.pattern.permute.xlu2 %v2591_v13  ;;  %v421_v18 = vpop.permute.xlu0 %420 }
  0xf5   : > { %v551_v20 = vmul.f32 %v421_v18, %v287_v19 }
  0xf6   : > { %475 = vperm.xlu1 %2269, %v2635_v37   ;;  %v378_v8 = vpop.permute.xlu2 %377 }
  0xf7   : > { %v544_v25 = vmul.f32 %v378_v8, %v2674_v7  ;;  %v2294_v8 = vld [vmem:[%s3380_s2] ss:$0 sm:$0xff] }
  0xf8   : > { %v372_v61 = vpop.permute.xlu1 %371 }
  0xfc   : > { %469 = vperm.xlu2 %2268, %v2635_v37  }
  0xfe   : > { %2272 = vset.pattern.permute.xlu1 %v2625_v35 }
 0x104   : > { %2271 = vset.pattern.permute.xlu2 %v2612_v31  ;;  %v451_v46 = vpop.permute.xlu0 %450 }
 0x105   : > { %v556_v48 = vmul.f32 %v451_v46, %v2678_v11 }
 0x106   : > { %493 = vperm.xlu1 %2272, %v2635_v37   ;;  %v396_v16 = vpop.permute.xlu2 %395 }
 0x107   : > { %v547_v28 = vmul.f32 %v396_v16, %v2653_v51 }
 0x108   : > { %v384_v63 = vpop.permute.xlu1 %383 }
 0x109   : > { %v545_v4 = vmul.f32 %v384_v63, %v2669_v62 }
 0x10b   : > { %634 = vperm.xlu0 %2275, %v545_v4  }
 0x10c   : > { %487 = vperm.xlu2 %2271, %v2635_v37  }
 0x10e   : > { %2274 = vset.pattern.permute.xlu1 %v2444_v44 }
 0x10f   : > { %598 = vperm.xlu1 %2274, %v533_v6   ;;  %v295_v6 = vld [vmem:[%s3381_s3] sm:$0xff] }
 0x110   : > { %v813_v10 = vperm.slane %v295_v6, 2  ;;  %v834_v18 = vperm.slane %v295_v6, 5 }
 0x114   : > { %2273 = vset.pattern.permute.xlu2 %v2621_v34  ;;  %v482_v59 = vpop.permute.xlu0 %481 }
 0x115   : > { %v561_v63 = vmul.f32 %v482_v59, %v2669_v62  ;;  %v2770_v59 = vld [vmem:[%s3381_s3 + $0x18] sm:$0xff] }
 0x116   : > { %v409_v23 = vpop.permute.xlu2 %408 }
 0x117   : > { %607 = vperm.xlu1 %2274, %v536_v9   ;;  %v549_v47 = vmul.f32 %v409_v23, %v285_v3  ;;  %v848_v23 = vperm.slane %v295_v6, 7 }
 0x118   : > { %v402_v12 = vpop.permute.xlu1 %401 }
 0x119   : > { %v548_v14 = vmul.f32 %v402_v12, %v2678_v11 }
 0x11b   : > { %643 = vperm.xlu0 %2275, %v548_v14   ;;  %v820_v14 = vperm.slane %v295_v6, 3 }
 0x11c   : > { %499 = vperm.xlu2 %2273, %v2635_v37   ;;  %v543_v37 = vmul.f32 %v372_v61, %v287_v19 }
 0x11f   : > { %613 = vperm.xlu1 %2274, %v538_v17  }
 0x123   : > { %652 = vperm.xlu0 %2275, %v551_v20   ;;  %v841_v20 = vperm.slane %v295_v6, 6 }
 0x124   : > { %2276 = vset.pattern.permute.xlu2 %v2444_v44 }
 0x125   : > { %604 = vperm.xlu2 %2276, %v535_v21  }
 0x126   : > { %v427_v26 = vpop.permute.xlu2 %426 }
 0x127   : > { %622 = vperm.xlu1 %2274, %v541_v22   ;;  %v552_v49 = vmul.f32 %v427_v26, %v2674_v7  ;;  %v2727_v22 = vld [vmem:[%s3381_s3 + $0x8] sm:$0xff] }
 0x128   : > { %v415_v36 = vpop.permute.xlu1 %414 }
 0x129   : > { %v550_v38 = vmul.f32 %v415_v36, %v2646_v45 }
 0x12d   : > { %610 = vperm.xlu2 %2276, %v537_v24  }
 0x12f   : > { %631 = vperm.xlu1 %2274, %v544_v25   ;;  %v862_v25 = vperm.slane %v2727_v22, 1 }
 0x135   : > { %619 = vperm.xlu2 %2276, %v540_v27   ;;  %v869_v27 = vperm.slane %v2727_v22, 2 }
 0x136   : > { %v439_v29 = vpop.permute.xlu2 %438 }
 0x137   : > { %v554_v32 = vmul.f32 %v439_v29, %v290_v15  ;;  %640 = vperm.xlu1 %2274, %v547_v28   ;;  %v876_v29 = vperm.slane %v2727_v22, 3 }
 0x138   : > { %v433_v39 = vpop.permute.xlu1 %432 }
 0x139   : > { %661 = vperm.xlu0 %2275, %v554_v32   ;;  %v553_v41 = vmul.f32 %v433_v39, %v2669_v62  ;;  %v799_v62 = vperm.slane %v295_v6, 0 }
 0x13d   : > { %628 = vperm.xlu2 %2276, %v543_v37   ;;  %v883_v37 = vperm.slane %v2727_v22, 4 }
 0x13f   : > { %649 = vperm.xlu1 %2274, %v550_v38   ;;  %v890_v38 = vperm.slane %v2727_v22, 5 }
 0x145   : > { %637 = vperm.xlu2 %2276, %v546_v40  }
 0x146   : > { %v458_v42 = vpop.permute.xlu2 %457 }
 0x147   : > { %v557_v43 = vmul.f32 %v458_v42, %v285_v3  ;;  %658 = vperm.xlu1 %2274, %v553_v41   ;;  %v2749_v42 = vld [vmem:[%s3381_s3 + $0x10] sm:$0xff] }
 0x148   : > { %v445_v53 = vpop.permute.xlu1 %444  ;;  %v911_v46 = vperm.slane %v2749_v42, 0 }
 0x149   : > { %670 = vperm.xlu0 %2275, %v557_v43   ;;  %v555_v54 = vmul.f32 %v445_v53, %v2653_v51  ;;  %v897_v43 = vperm.slane %v2727_v22, 6 }
 0x14d   : > { %646 = vperm.xlu2 %2276, %v549_v47  }
 0x14f   : > { %667 = vperm.xlu1 %2274, %v556_v48  }
 0x155   : > { %655 = vperm.xlu2 %2276, %v552_v49  }
 0x156   : > { %v470_v50 = vpop.permute.xlu2 %469 }
 0x157   : > { %v559_v52 = vmul.f32 %v470_v50, %v287_v19  ;;  %v2720_v19 = vpop.permute.xlu0 %601  ;;  %v918_v50 = vperm.slane %v2749_v42, 1 }
 0x158   : > { %v464_v55 = vpop.permute.xlu1 %463 }
 0x159   : > { %676 = vperm.xlu1 %2274, %v559_v52   ;;  %v558_v56 = vmul.f32 %v464_v55, %v2646_v45  ;;  %v932_v52 = vperm.slane %v2749_v42, 3  ;;  %v939_v55 = vperm.slane %v2749_v42, 4 }
 0x15d   : > { %664 = vperm.xlu2 %2276, %v555_v54  }
 0x15f   : > { %v2732_v26 = vpop.permute.xlu0 %616 }
 0x165   : > { %673 = vperm.xlu2 %2276, %v558_v56  }
 0x166   : > { %v488_v57 = vpop.permute.xlu2 %487 }
 0x167   : > { %v562_v58 = vmul.f32 %v488_v57, %v290_v15  ;;  %v827_v15 = vperm.slane %v295_v6, 4  ;;  %v626_v32 = vpop.permute.xlu0 %625  ;;  %v953_v57 = vperm.slane %v2749_v42, 6 }
 0x168   : > { %v476_v60 = vpop.permute.xlu1 %475 }
 0x169   : > { %v560_v61 = vmul.f32 %v476_v60, %v2674_v7  ;;  %685 = vperm.xlu1 %2274, %v562_v58   ;;  %v960_v60 = vperm.slane %v2749_v42, 7 }
 0x16b   : > { %679 = vperm.xlu0 %2275, %v560_v61   ;;  %v2774_v61 = vand.u32 127, %v306_v0 }
 0x16d   : > { %682 = vperm.xlu2 %2276, %v561_v63   ;;  %v700_v0 = vadd.s32 4294967280, %v2774_v61 }
 0x171   : > { %2279 = vset.pattern.permute.xlu1 %v2576_v1 }
 0x176   : > { %v500_v3 = vpop.permute.xlu2 %499 }
 0x177   : > { %v564_v4 = vmul.f32 %v500_v3, %v2678_v11  ;;  %v974_v3 = vperm.slane %v2770_v59, 1 }
 0x178   : > { %v494_v5 = vpop.permute.xlu1 %493 }
 0x179   : > { %v563_v45 = vmul.f32 %v494_v5, %v2653_v51  ;;  %691 = vperm.xlu2 %2276, %v564_v4   ;;  %v806_v51 = vperm.slane %v295_v6, 1  ;;  %v696_v4 = vadd.s32 4294967288, %v2774_v61 }
 0x17b   : > { %688 = vperm.xlu0 %2275, %v563_v45   ;;  %v697_v45 = vperm.slane %v2720_v19, %v696_v4 }
 0x17d   : > { %v2742_v39 = vpop.permute.xlu0 %634 }
 0x17f   : > { %v2705_v7 = vpop.permute.xlu2 %604 }
 0x181   : > { %2278 = vset.pattern.permute.xlu2 %v2576_v1  ;;  %v2710_v9 = vpop.permute.xlu1 %598 }
 0x182   : > { %v695_v6 = vperm.slane %v2710_v9, %v2774_v61 }
 0x183   : > { %2277 = vset.pattern.permute.xlu0 %v2576_v1 }
 0x184   : > { %v699_v9 = vsel %vm698_vm0, %v697_v45, %v695_v6 }
 0x187   : > { %v2712_v11 = vpop.permute.xlu2 %610 }
 0x189   : > { %804 = vperm.xlu2 %2278, %v799_v62   ;;  %v2714_v12 = vpop.permute.xlu1 %607  ;;  %v2784_v62 = vadd.s32 4294967272, %v2774_v61 }
 0x18b   : > { %786 = vperm.xlu0 %2277, %v2294_v8   ;;  %v705_v19 = vperm.slane %v2714_v12, %v2784_v62  ;;  %v2808_v12 = vadd.s32 4294967248, %v2774_v61 }
 0x18d   : > { %v2753_v47 = vpop.permute.xlu0 %643 }
 0x18f   : > { %v2716_v16 = vpop.permute.xlu2 %619 }
 0x191   : > { %811 = vperm.xlu2 %2278, %v806_v51   ;;  %v2718_v17 = vpop.permute.xlu1 %613 }
 0x193   : > { %818 = vperm.xlu0 %2277, %v813_v10  }
 0x195   : > { %v653_v53 = vpop.permute.xlu0 %652 }
 0x197   : > { %v2722_v21 = vpop.permute.xlu2 %628 }
 0x199   : > { %825 = vperm.xlu2 %2278, %v820_v14   ;;  %v2729_v24 = vpop.permute.xlu1 %622  ;;  %v725_v14 = vperm.slane %v626_v32, %v696_v4  ;;  %v727_v32 = vperm.slane %v2722_v21, %v700_v0 }
 0x19a   : > { %v724_v51 = vperm.slane %v2729_v24, %v2774_v61 }
 0x19b   : > { %832 = vperm.xlu0 %2277, %v827_v15   ;;  %v2790_v15 = vadd.s32 4294967264, %v2774_v61 }
 0x19c   : > { %v726_v24 = vsel %vm698_vm0, %v725_v14, %v724_v51 }
 0x19d   : > { %v728_v21 = vsel %vm702_vm1, %v727_v32, %v726_v24 }
 0x19f   : > { %v2735_v28 = vpop.permute.xlu2 %637 }
 0x1a1   : > { %839 = vperm.xlu2 %2278, %v834_v18   ;;  %v2738_v36 = vpop.permute.xlu1 %631  ;;  %v981_v18 = vperm.slane %v2770_v59, 2 }
 0x1a3   : > { %846 = vperm.xlu0 %2277, %v841_v20  }
 0x1a7   : > { %v647_v40 = vpop.permute.xlu2 %646 }
 0x1a8   : > { %v739_v20 = vperm.slane %v647_v40, %v2774_v61  ;;  %v2812_v40 = vadd.s32 4294967240, %v2774_v61 }
 0x1a9   : > { %853 = vperm.xlu2 %2278, %v848_v23   ;;  %v2744_v41 = vpop.permute.xlu1 %640  ;;  %v701_v23 = vperm.slane %v2705_v7, %v700_v0 }
 0x1ab   : > { %867 = vperm.xlu0 %2277, %v862_v25   ;;  %v2765_v58 = vpop.permute.xlu0 %661  ;;  %v729_v25 = vperm.slane %v2738_v36, %v2784_v62  ;;  %v703_v7 = vsel %vm702_vm1, %v701_v23, %v699_v9  ;;  %v717_v9 = vperm.slane %v2732_v26, %v2808_v12  ;;  %v737_v26 = vperm.slane %v2753_v47, %v2812_v40 }
 0x1af   : > { %v2755_v48 = vpop.permute.xlu2 %655 }
 0x1b1   : > { %874 = vperm.xlu2 %2278, %v869_v27   ;;  %v650_v49 = vpop.permute.xlu1 %649  ;;  %v995_v27 = vperm.slane %v2770_v59, 4 }
 0x1b2   : > { %v740_v10 = vperm.slane %v650_v49, %v696_v4  ;;  %v707_v49 = vsel %vm706_vm2, %v705_v19, %v703_v7 }
 0x1b3   : > { %881 = vperm.xlu0 %2277, %v876_v29   ;;  %v2803_v29 = vadd.s32 4294967256, %v2774_v61 }
 0x1b5   : > { %v748_v14 = vperm.slane %v2765_v58, %v2803_v29 }
 0x1b7   : > { %v2759_v54 = vpop.permute.xlu2 %664 }
 0x1b9   : > { %888 = vperm.xlu2 %2278, %v883_v37   ;;  %v2762_v56 = vpop.permute.xlu1 %658  ;;  %v741_v37 = vsel %vm698_vm0, %v740_v10, %v739_v20  ;;  %v1002_v10 = vperm.slane %v2770_v59, 5 }
 0x1bb   : > { %895 = vperm.xlu0 %2277, %v890_v38   ;;  %v671_v8 = vpop.permute.xlu0 %670 }
 0x1bc   : > { %v754_v6 = vperm.slane %v671_v8, %v2774_v61 }
 0x1bf   : > { %v674_v63 = vpop.permute.xlu2 %673 }
 0x1c1   : > { %902 = vperm.xlu2 %2278, %v897_v43   ;;  %v2778_v5 = vpop.permute.xlu1 %667  ;;  %v742_v43 = vperm.slane %v653_v53, %v700_v0  ;;  %v709_v53 = vperm.slane %v2712_v11, %v2790_v15  ;;  %v735_v11 = vperm.slane %v2744_v41, %v2808_v12 }
 0x1c2   : > { %v752_v24 = vperm.slane %v2778_v5, %v2812_v40  ;;  %v721_v5 = vperm.slane %v2716_v16, %v2812_v40 }
 0x1c3   : > { %916 = vperm.xlu0 %2277, %v911_v46   ;;  %v731_v46 = vperm.slane %v2742_v39, %v2790_v15  ;;  %v713_v39 = vperm.slane %v2718_v17, %v2803_v29 }
 0x1c7   : > { %v683_v38 = vpop.permute.xlu2 %682 }
 0x1c8   : > { %v761_v58 = vperm.slane %v683_v38, %v2790_v15 }
 0x1c9   : > { %923 = vperm.xlu2 %2278, %v918_v50  }
 0x1cb   : > { %937 = vperm.xlu0 %2277, %v932_v52   ;;  %v677_v36 = vpop.permute.xlu1 %676  ;;  %v730_v52 = vsel %vm706_vm2, %v729_v25, %v728_v21 }
 0x1cc   : > { %v757_v45 = vperm.slane %v677_v36, %v700_v0 }
 0x1d1   : > { %944 = vperm.xlu2 %2278, %v939_v55   ;;  %v743_v55 = vsel %vm702_vm1, %v742_v43, %v741_v37  ;;  %v750_v37 = vperm.slane %v2759_v54, %v2808_v12 }
 0x1d3   : > { %958 = vperm.xlu0 %2277, %v953_v57   ;;  %v746_v57 = vperm.slane %v2762_v56, %v2790_v15  ;;  %v711_v56 = vsel %vm710_vm3, %v709_v53, %v707_v49  ;;  %v692_v41 = vpop.permute.xlu2 %691 }
 0x1d4   : > { %v715_v0 = vsel %vm714_vm4, %v713_v39, %v711_v56  ;;  %v767_v16 = vperm.slane %v692_v41, %v2812_v40 }
 0x1d5   : > { %v719_v32 = vsel %vm718_vm5, %v717_v9, %v715_v0 }
 0x1d6   : > { %v723_v54 = vsel %vm722_vm6, %v721_v5, %v719_v32  ;;  %v2936_v5 = vld [vmem:[%s3381_s3 + $0x38] sm:$0xff] }
 0x1d9   : > { %965 = vperm.xlu2 %2278, %v960_v60   ;;  %v755_v60 = vperm.slane %v674_v63, %v696_v4  ;;  %v732_v63 = vsel %vm710_vm3, %v731_v46, %v730_v52 }
 0x1db   : > { %979 = vperm.xlu0 %2277, %v974_v3   ;;  %v744_v3 = vperm.slane %v2755_v48, %v2784_v62  ;;  %v733_v48 = vperm.slane %v2735_v28, %v2803_v29  ;;  %v756_v8 = vsel %vm698_vm0, %v755_v60, %v754_v6  ;;  %v686_v25 = vpop.permute.xlu1 %685 }
 0x1dc   : > { %v763_v38 = vperm.slane %v686_v25, %v2803_v29 }
 0x1dd   : > { %v680_v50 = vpop.permute.xlu0 %679  ;;  %v745_v17 = vsel %vm706_vm2, %v744_v3, %v743_v55  ;;  %v734_v28 = vsel %vm714_vm4, %v733_v48, %v732_v63  ;;  %v855_v48 = vperm.slane %v2727_v22, 0 }
 0x1de   : > { %v759_v51 = vperm.slane %v680_v50, %v2784_v62  ;;  %v747_v4 = vsel %vm710_vm3, %v746_v57, %v745_v17  ;;  %v1016_v62 = vperm.slane %v2770_v59, 7  ;;  %v736_v20 = vsel %vm718_vm5, %v735_v11, %v734_v28 }
 0x1df   : > { %v749_v23 = vsel %vm714_vm4, %v748_v14, %v747_v4  ;;  %v738_v47 = vsel %vm722_vm6, %v737_v26, %v736_v20  ;;  %v904_v14 = vperm.slane %v2727_v22, 7 }
 0x1e0   : > { %v751_v36 = vsel %vm718_vm5, %v750_v37, %v749_v23  ;;  %v770_v55 = vsel %vm769_vm7, %v738_v47, %v723_v54  ;;  %v967_v37 = vperm.slane %v2770_v59, 0  ;;  %v1212_v47 = vperm.slane %v2936_v5, 3 }
 0x1e1   : > { %986 = vperm.xlu2 %2278, %v981_v18   ;;  %v758_v18 = vsel %vm702_vm1, %v757_v45, %v756_v8  ;;  %v753_v49 = vsel %vm722_vm6, %v752_v24, %v751_v36  ;;  %v2891_v45 = vld [vmem:[%s3381_s3 + $0x28] sm:$0xff]  ;;  %v946_v24 = vperm.slane %v2749_v42, 5 }
 0x1e2   : > { %v760_v19 = vsel %vm706_vm2, %v759_v51, %v758_v18  ;;  %v772_v57 = vsel %vm771_vm8, %v753_v49, %v770_v55  ;;  %v1086_v63 = vperm.slane %v2891_v45, 1  ;;  %v1100_v17 = vperm.slane %v2891_v45, 3  ;;  %v2914_v18 = vld [vmem:[%s3381_s3 + $0x30] sm:$0xff] }
 0x1e3   : > { %1000 = vperm.xlu0 %2277, %v995_v27   ;;  %v2857_v27 = vld [vmem:[%s3381_s3 + $0x20] sm:$0xff]  ;;  %v762_v15 = vsel %vm710_vm3, %v761_v58, %v760_v19  ;;  %v2877_v50 = vpop.permute.xlu2 %804  ;;  %v1107_v4 = vperm.slane %v2891_v45, 4  ;;  %v1128_v41 = vperm.slane %v2891_v45, 7  ;;  %v1142_v9 = vperm.slane %v2914_v18, 1 }
 0x1e4   : > { %v1023_v43 = vperm.slane %v2857_v27, 0  ;;  %v1037_v21 = vperm.slane %v2857_v27, 2  ;;  %v764_v29 = vsel %vm714_vm4, %v763_v38, %v762_v15  ;;  %v1044_v53 = vperm.slane %v2857_v27, 3 }
 0x1e5   : > { %v1058_v39 = vperm.slane %v2857_v27, 5  ;;  %v1065_v51 = vperm.slane %v2857_v27, 6  ;;  %v925_v19 = vperm.slane %v2749_v42, 2  ;;  %v1149_v22 = vperm.slane %v2914_v18, 2 }
 0x1e6   : > { %v1163_v23 = vperm.slane %v2914_v18, 4  ;;  %v1170_v26 = vperm.slane %v2914_v18, 5  ;;  %v1184_v32 = vperm.slane %v2914_v18, 7  ;;  %v1191_v15 = vperm.slane %v2936_v5, 0 }
 0x1e7   : > { %v1009_v49 = vperm.slane %v2770_v59, 6  ;;  %v1051_v55 = vperm.slane %v2857_v27, 4 }
 0x1e9   : > { %1007 = vperm.xlu2 %2278, %v1002_v10   ;;  %v1079_v10 = vperm.slane %v2891_v45, 0 }
 0x1eb   : > { %1021 = vperm.xlu0 %2277, %v1016_v62   ;;  %v2886_v3 = vpop.permute.xlu2 %811  ;;  %v1121_v62 = vperm.slane %v2891_v45, 6 }
 0x1ed   : > { %v689_v7 = vpop.permute.xlu0 %688 }
 0x1ee   : > { %v765_v46 = vperm.slane %v689_v7, %v2808_v12  ;;  %v1205_v7 = vperm.slane %v2936_v5, 2 }
 0x1f0   : > { %v766_v52 = vsel %vm718_vm5, %v765_v46, %v764_v29  ;;  %v1226_v46 = vperm.slane %v2936_v5, 5  ;;  %v1030_v29 = vperm.slane %v2857_v27, 1 }
 0x1f1   : > { %1028 = vperm.xlu2 %2278, %v1023_v43   ;;  %v768_v12 = vsel %vm722_vm6, %v767_v16, %v766_v52  ;;  %v988_v43 = vperm.slane %v2770_v59, 3  ;;  %v1233_v16 = vperm.slane %v2936_v5, 6 }
 0x1f2   : > { %v774_v60 = vsel %vm773_vm9, %v768_v12, %v772_v57  ;;  %v1072_v57 = vperm.slane %v2857_v27, 7 }
 0x1f3   : > { %1042 = vperm.xlu0 %2277, %v1037_v21   ;;  %v777_v40 = vsel %vm776_vm10, %v774_v60, 0.0  ;;  %v2897_v56 = vpop.permute.xlu2 %825 }
 0x1f4   : > { %778 = vadd.xlane.f32.xlu1 %v777_v40 }
 0x1f9   : > { %1049 = vperm.xlu2 %2278, %v1044_v53   ;;  %v1093_v53 = vperm.slane %v2891_v45, 2 }
 0x1fb   : > { %1063 = vperm.xlu0 %2277, %v1058_v39   ;;  %v2905_v8 = vpop.permute.xlu2 %839 }
 0x1fd   : > { %v2893_v6 = vpop.permute.xlu0 %786 }
 0x201   : > { %1070 = vperm.xlu2 %2278, %v1065_v51  }
 0x203   : > { %1084 = vperm.xlu0 %2277, %v1079_v10   ;;  %v2918_v28 = vpop.permute.xlu2 %853  ;;  %v1114_v10 = vperm.slane %v2891_v45, 5  ;;  %v1156_v45 = vperm.slane %v2914_v18, 3 }
 0x205   : > { %v2900_v11 = vpop.permute.xlu0 %818 }
 0x209   : > { %1091 = vperm.xlu2 %2278, %v1086_v63  }
 0x20b   : > { %1105 = vperm.xlu0 %2277, %v1100_v17   ;;  %v2926_v58 = vpop.permute.xlu2 %874 }
 0x20d   : > { %860 = vperm.xlu1 %2279, %v855_v48   ;;  %v2908_v0 = vpop.permute.xlu0 %832  ;;  %v1135_v48 = vperm.slane %v2914_v18, 0 }
 0x211   : > { %1112 = vperm.xlu2 %2278, %v1107_v4  }
 0x213   : > { %1126 = vperm.xlu0 %2277, %v1121_v62   ;;  %v2938_v42 = vpop.permute.xlu2 %888 }
 0x215   : > { %909 = vperm.xlu1 %2279, %v904_v14   ;;  %v2921_v20 = vpop.permute.xlu0 %846 }
 0x219   : > { %1133 = vperm.xlu2 %2278, %v1128_v41  }
 0x21b   : > { %1147 = vperm.xlu0 %2277, %v1142_v9   ;;  %v2946_v36 = vpop.permute.xlu2 %902 }
 0x21d   : > { %930 = vperm.xlu1 %2279, %v925_v19   ;;  %v2928_v25 = vpop.permute.xlu0 %867 }
 0x221   : > { %1154 = vperm.xlu2 %2278, %v1149_v22  }
 0x223   : > { %1168 = vperm.xlu0 %2277, %v1163_v23   ;;  %v2953_v21 = vpop.permute.xlu2 %923 }
 0x225   : > { %951 = vperm.xlu1 %2279, %v946_v24   ;;  %v2941_v38 = vpop.permute.xlu0 %881 }
 0x229   : > { %1175 = vperm.xlu2 %2278, %v1170_v26  }
 0x22b   : > { %1189 = vperm.xlu0 %2277, %v1184_v32   ;;  %v2961_v12 = vpop.permute.xlu2 %944  ;;  %v1198_v32 = vperm.slane %v2936_v5, 1 }
 0x22d   : > { %972 = vperm.xlu1 %2279, %v967_v37   ;;  %v2949_v54 = vpop.permute.xlu0 %895 }
 0x231   : > { %1196 = vperm.xlu2 %2278, %v1191_v15  }
 0x233   : > { %1210 = vperm.xlu0 %2277, %v1205_v7   ;;  %v2966_v60 = vpop.permute.xlu2 %965  ;;  %v1219_v7 = vperm.slane %v2936_v5, 4 }
 0x235   : > { %993 = vperm.xlu1 %2279, %v988_v43   ;;  %v2956_v52 = vpop.permute.xlu0 %916 }
 0x239   : > { %1217 = vperm.xlu2 %2278, %v1212_v47  }
 0x23b   : > { %1231 = vperm.xlu0 %2277, %v1226_v46   ;;  %v2971_v39 = vpop.permute.xlu2 %986 }
 0x23d   : > { %1014 = vperm.xlu1 %2279, %v1009_v49   ;;  %v2963_v59 = vpop.permute.xlu0 %937  ;;  %v1240_v49 = vperm.slane %v2936_v5, 7 }
 0x241   : > { %1238 = vperm.xlu2 %2278, %v1233_v16  }
 0x243   : > { %2280 = vset.pattern.permute.xlu0 %v2444_v44  ;;  %v2976_v17 = vpop.permute.xlu2 %1007 }
 0x245   : > { %1035 = vperm.xlu1 %2279, %v1030_v29   ;;  %v2968_v40 = vpop.permute.xlu0 %958 }
 0x249   : > { %2281 = vset.pattern.permute.xlu2 %v2444_v44 }
 0x24b   : > { %v2989_v9 = vpop.permute.xlu2 %1028 }
 0x24d   : > { %1056 = vperm.xlu1 %2279, %v1051_v55   ;;  %v2973_v51 = vpop.permute.xlu0 %979 }
 0x255   : > { %1077 = vperm.xlu1 %2279, %v1072_v57   ;;  %v2982_v62 = vpop.permute.xlu0 %1000 }
 0x25d   : > { %1098 = vperm.xlu1 %2279, %v1093_v53   ;;  %v2993_v19 = vpop.permute.xlu0 %1021 }
 0x265   : > { %1119 = vperm.xlu1 %2279, %v1114_v10   ;;  %v3002_v24 = vpop.permute.xlu0 %1042 }
 0x267   : > { %v779_v63 = vpop.xlane.xlu1 %778 }
 0x268   : > { %v789_v27 = vadd.f32 %v2893_v6, %v779_v63 }
 0x26a   : > { %v2980_v4 = vmax.f32 %v789_v27, 0.0 }
 0x26c   : > { %v1311_v14 = vmul.f32 %v2877_v50, %v2980_v4  ;;  %v1312_v41 = vmul.f32 %v2886_v3, %v2980_v4  ;;  %v1314_v6 = vmul.f32 %v2897_v56, %v2980_v4  ;;  %v1316_v22 = vmul.f32 %v2905_v8, %v2980_v4  ;;  %v2998_v3 = vpop.permute.xlu2 %1049 }
 0x26d   : > { %1140 = vperm.xlu1 %2279, %v1135_v48   ;;  %v1177_v50 = vperm.slane %v2914_v18, 6  ;;  %v1317_v23 = vmul.f32 %v2921_v20, %v2980_v4  ;;  %v1320_v8 = vmul.f32 %v2928_v25, %v2980_v4  ;;  %v1322_v20 = vmul.f32 %v2941_v38, %v2980_v4  ;;  %v3012_v15 = vpop.permute.xlu0 %1063 }
 0x26e   : > { %1443 = vperm.xlu2 %2281, %v1312_v41   ;;  %1440 = vperm.xlu0 %2280, %v1311_v14   ;;  %v1323_v43 = vmul.f32 %v2938_v42, %v2980_v4  ;;  %v1325_v46 = vmul.f32 %v2946_v36, %v2980_v4  ;;  %v1328_v42 = vmul.f32 %v2953_v21, %v2980_v4 }
 0x26f   : > { %v1313_v57 = vmul.f32 %v2900_v11, %v2980_v4  ;;  %v1331_v10 = vmul.f32 %v2961_v12, %v2980_v4  ;;  %v1315_v21 = vmul.f32 %v2908_v0, %v2980_v4  ;;  %v1334_v14 = vmul.f32 %v2966_v60, %v2980_v4 }
 0x270   : > { %v1318_v12 = vmul.f32 %v2918_v28, %v2980_v4  ;;  %v1321_v60 = vmul.f32 %v2926_v58, %v2980_v4 }
 0x274   : > { %v3008_v18 = vpop.permute.xlu2 %1070 }
 0x275   : > { %1161 = vperm.xlu1 %2279, %v1156_v45   ;;  %v3022_v38 = vpop.permute.xlu0 %1084 }
 0x276   : > { %1449 = vperm.xlu2 %2281, %v1314_v6   ;;  %1455 = vperm.xlu0 %2280, %v1316_v22   ;;  %v1337_v6 = vmul.f32 %v2971_v39, %v2980_v4  ;;  %v1324_v39 = vmul.f32 %v2949_v54, %v2980_v4 }
 0x27c   : > { %v3017_v25 = vpop.permute.xlu2 %1091 }
 0x27d   : > { %1182 = vperm.xlu1 %2279, %v1177_v50   ;;  %v3032_v5 = vpop.permute.xlu0 %1105 }
 0x27e   : > { %1458 = vperm.xlu2 %2281, %v1317_v23   ;;  %v1340_v23 = vmul.f32 %v2976_v17, %v2980_v4  ;;  %v1327_v17 = vmul.f32 %v2956_v52, %v2980_v4 }
 0x27f   : > { %v861_v56 = vpop.permute.xlu1 %860 }
 0x280   : > { %v1319_v26 = vmul.f32 %v861_v56, %v2980_v4 }
 0x282   : > { %1464 = vperm.xlu0 %2280, %v1319_v26  }
 0x284   : > { %v3027_v55 = vpop.permute.xlu2 %1112 }
 0x285   : > { %1203 = vperm.xlu1 %2279, %v1198_v32   ;;  %v3042_v27 = vpop.permute.xlu0 %1126 }
 0x286   : > { %1467 = vperm.xlu2 %2281, %v1320_v8   ;;  %v1343_v8 = vmul.f32 %v2989_v9, %v2980_v4  ;;  %v1330_v9 = vmul.f32 %v2963_v59, %v2980_v4 }
 0x287   : > { %v910_v37 = vpop.permute.xlu1 %909 }
 0x288   : > { %v1326_v16 = vmul.f32 %v910_v37, %v2980_v4 }
 0x28a   : > { %1473 = vperm.xlu0 %2280, %v1322_v20  }
 0x28c   : > { %v3039_v63 = vpop.permute.xlu2 %1133 }
 0x28d   : > { %1224 = vperm.xlu1 %2279, %v1219_v7   ;;  %v3053_v22 = vpop.permute.xlu0 %1147 }
 0x28e   : > { %1476 = vperm.xlu2 %2281, %v1323_v43   ;;  %v1346_v43 = vmul.f32 %v2998_v3, %v2980_v4  ;;  %v1333_v3 = vmul.f32 %v2968_v40, %v2980_v4 }
 0x28f   : > { %v931_v47 = vpop.permute.xlu1 %930 }
 0x290   : > { %v1329_v36 = vmul.f32 %v931_v47, %v2980_v4 }
 0x292   : > { %1482 = vperm.xlu0 %2280, %v1325_v46  }
 0x294   : > { %v3049_v45 = vpop.permute.xlu2 %1154 }
 0x295   : > { %1245 = vperm.xlu1 %2279, %v1240_v49   ;;  %v3062_v26 = vpop.permute.xlu0 %1168 }
 0x296   : > { %1485 = vperm.xlu2 %2281, %v1326_v16   ;;  %v1349_v16 = vmul.f32 %v3008_v18, %v2980_v4  ;;  %v1336_v18 = vmul.f32 %v2973_v51, %v2980_v4 }
 0x297   : > { %v952_v29 = vpop.permute.xlu1 %951 }
 0x298   : > { %v1332_v11 = vmul.f32 %v952_v29, %v2980_v4 }
 0x29a   : > { %1491 = vperm.xlu0 %2280, %v1328_v42  }
 0x29c   : > { %v3060_v56 = vpop.permute.xlu2 %1175 }
 0x29d   : > { %2282 = vset.pattern.permute.xlu1 %v2444_v44  ;;  %v3074_v7 = vpop.permute.xlu0 %1189 }
 0x29e   : > { %1446 = vperm.xlu1 %2282, %v1313_v57   ;;  %1494 = vperm.xlu2 %2281, %v1329_v36   ;;  %v1352_v57 = vmul.f32 %v3017_v25, %v2980_v4 }
 0x29f   : > { %v973_v53 = vpop.permute.xlu1 %972 }
 0x2a0   : > { %v1335_v41 = vmul.f32 %v973_v53, %v2980_v4 }
 0x2a2   : > { %1500 = vperm.xlu0 %2280, %v1331_v10  }
 0x2a4   : > { %v3069_v37 = vpop.permute.xlu2 %1196 }
 0x2a5   : > { %v3083_v52 = vpop.permute.xlu0 %1210 }
 0x2a6   : > { %1452 = vperm.xlu1 %2282, %v1315_v21   ;;  %1503 = vperm.xlu2 %2281, %v1332_v11   ;;  %v1355_v21 = vmul.f32 %v3027_v55, %v2980_v4 }
 0x2a7   : > { %v994_v48 = vpop.permute.xlu1 %993 }
 0x2a8   : > { %v1338_v50 = vmul.f32 %v994_v48, %v2980_v4 }
 0x2aa   : > { %1509 = vperm.xlu0 %2280, %v1334_v14   ;;  %v1339_v14 = vmul.f32 %v2982_v62, %v2980_v4 }
 0x2ac   : > { %v3080_v47 = vpop.permute.xlu2 %1217 }
 0x2ad   : > { %v3094_v36 = vpop.permute.xlu0 %1231 }
 0x2ae   : > { %1461 = vperm.xlu1 %2282, %v1318_v12   ;;  %1512 = vperm.xlu2 %2281, %v1335_v41  }
 0x2af   : > { %v1015_v0 = vpop.permute.xlu1 %1014 }
 0x2b0   : > { %v1341_v32 = vmul.f32 %v1015_v0, %v2980_v4  ;;  %v1358_v0 = vmul.f32 %v3039_v63, %v2980_v4 }
 0x2b2   : > { %1518 = vperm.xlu0 %2280, %v1337_v6   ;;  %v1342_v6 = vmul.f32 %v2993_v19, %v2980_v4  ;;  %v1364_v19 = vmul.f32 %v3060_v56, %v2980_v4  ;;  %v1351_v56 = vmul.f32 %v3022_v38, %v2980_v4 }
 0x2b4   : > { %v3090_v42 = vpop.permute.xlu2 %1238 }
 0x2b6   : > { %1470 = vperm.xlu1 %2282, %v1321_v60   ;;  %1521 = vperm.xlu2 %2281, %v1338_v50   ;;  %v1361_v50 = vmul.f32 %v3049_v45, %v2980_v4  ;;  %v1348_v45 = vmul.f32 %v3012_v15, %v2980_v4 }
 0x2b7   : > { %v1036_v28 = vpop.permute.xlu1 %1035 }
 0x2b8   : > { %v1344_v20 = vmul.f32 %v1036_v28, %v2980_v4 }
 0x2ba   : > { %1527 = vperm.xlu0 %2280, %v1340_v23  }
 0x2be   : > { %1530 = vperm.xlu2 %2281, %v1341_v32   ;;  %1479 = vperm.xlu1 %2282, %v1324_v39   ;;  %v1345_v39 = vmul.f32 %v3002_v24, %v2980_v4 }
 0x2bf   : > { %v1057_v58 = vpop.permute.xlu1 %1056 }
 0x2c0   : > { %v1347_v46 = vmul.f32 %v1057_v58, %v2980_v4 }
 0x2c2   : > { %1536 = vperm.xlu0 %2280, %v1343_v8  }
 0x2c6   : > { %1539 = vperm.xlu2 %2281, %v1344_v20   ;;  %1488 = vperm.xlu1 %2282, %v1327_v17   ;;  %v1367_v20 = vmul.f32 %v3069_v37, %v2980_v4 }
 0x2c7   : > { %v1078_v54 = vpop.permute.xlu1 %1077 }
 0x2c8   : > { %v1350_v29 = vmul.f32 %v1078_v54, %v2980_v4  ;;  %v1444_v10 = vpop.permute.xlu2 %1443 }
 0x2c9   : > { %v1632_v48 = vperm.slane %v1444_v10, %v2774_v61 }
 0x2ca   : > { %1545 = vperm.xlu0 %2280, %v1346_v43  }
 0x2ce   : > { %1548 = vperm.xlu2 %2281, %v1347_v46   ;;  %1497 = vperm.xlu1 %2282, %v1330_v9   ;;  %v1370_v46 = vmul.f32 %v3080_v47, %v2980_v4 }
 0x2cf   : > { %v1099_v49 = vpop.permute.xlu1 %1098 }
 0x2d0   : > { %v1353_v53 = vmul.f32 %v1099_v49, %v2980_v4  ;;  %v1450_v55 = vpop.permute.xlu2 %1449  ;;  %v1354_v49 = vmul.f32 %v3032_v5, %v2980_v4  ;;  %v1357_v5 = vmul.f32 %v3042_v27, %v2980_v4 }
 0x2d2   : > { %1554 = vperm.xlu0 %2280, %v1349_v16   ;;  %v1373_v16 = vmul.f32 %v3090_v42, %v2980_v4 }
 0x2d6   : > { %1557 = vperm.xlu2 %2281, %v1350_v29   ;;  %1506 = vperm.xlu1 %2282, %v1333_v3  }
 0x2d7   : > { %v1120_v59 = vpop.permute.xlu1 %1119 }
 0x2d8   : > { %v1356_v51 = vmul.f32 %v1120_v59, %v2980_v4  ;;  %v1459_v28 = vpop.permute.xlu2 %1458 }
 0x2d9   : > { %v1637_v27 = vperm.slane %v1459_v28, %v2774_v61  ;;  %v1366_v28 = vmul.f32 %v3074_v7, %v2980_v4 }
 0x2da   : > { %1563 = vperm.xlu0 %2280, %v1352_v57   ;;  %v1634_v57 = vperm.slane %v1450_v55, %v2774_v61  ;;  %v1363_v55 = vmul.f32 %v3062_v26, %v2980_v4 }
 0x2de   : > { %1566 = vperm.xlu2 %2281, %v1353_v53   ;;  %1515 = vperm.xlu1 %2282, %v1336_v18  }
 0x2df   : > { %v1141_v40 = vpop.permute.xlu1 %1140 }
 0x2e0   : > { %v1441_v11 = vpop.permute.xlu0 %1440  ;;  %v1359_v60 = vmul.f32 %v1141_v40, %v2980_v4  ;;  %v3123_v8 = vpop.permute.xlu2 %1467 }
 0x2e1   : > { %v1631_v25 = vperm.slane %v1441_v11, %v2774_v61 }
 0x2e2   : > { %1572 = vperm.xlu0 %2280, %v1355_v21  }
 0x2e3   : > { %v1695_v12 = vsel %vm769_vm7, %v1632_v48, %v1631_v25  ;;  %v1360_v25 = vmul.f32 %v3053_v22, %v2980_v4 }
 0x2e6   : > { %1575 = vperm.xlu2 %2281, %v1356_v51   ;;  %1524 = vperm.xlu1 %2282, %v1339_v14  }
 0x2e7   : > { %v1162_v41 = vpop.permute.xlu1 %1161 }
 0x2e8   : > { %v1456_v23 = vpop.permute.xlu0 %1455  ;;  %v1362_v63 = vmul.f32 %v1162_v41, %v2980_v4  ;;  %v3131_v9 = vpop.permute.xlu2 %1476 }
 0x2e9   : > { %v1636_v21 = vperm.slane %v1456_v23, %v2774_v61 }
 0x2ea   : > { %1581 = vperm.xlu0 %2280, %v1358_v0  }
 0x2ee   : > { %1584 = vperm.xlu2 %2281, %v1359_v60   ;;  %1533 = vperm.xlu1 %2282, %v1342_v6  }
 0x2ef   : > { %v1183_v62 = vpop.permute.xlu1 %1182 }
 0x2f0   : > { %v1365_v17 = vmul.f32 %v1183_v62, %v2980_v4  ;;  %v1486_v3 = vpop.permute.xlu2 %1485 }
 0x2f2   : > { %1590 = vperm.xlu0 %2280, %v1361_v50  }
 0x2f4   : > { %v3119_v58 = vpop.permute.xlu0 %1464 }
 0x2f5   : > { %v1639_v22 = vperm.slane %v3119_v58, %v2774_v61 }
 0x2f6   : > { %1593 = vperm.xlu2 %2281, %v1362_v63   ;;  %1542 = vperm.xlu1 %2282, %v1345_v39  }
 0x2f7   : > { %v1204_v32 = vpop.permute.xlu1 %1203 }
 0x2f8   : > { %v1368_v54 = vmul.f32 %v1204_v32, %v2980_v4  ;;  %v1495_v11 = vpop.permute.xlu2 %1494 }
 0x2fa   : > { %1599 = vperm.xlu0 %2280, %v1364_v19   ;;  %v1643_v19 = vperm.slane %v3131_v9, %v2774_v61 }
 0x2fc   : > { %v1474_v43 = vpop.permute.xlu0 %1473 }
 0x2fd   : > { %v1642_v26 = vperm.slane %v1474_v43, %v2774_v61 }
 0x2fe   : > { %1602 = vperm.xlu2 %2281, %v1365_v17   ;;  %1551 = vperm.xlu1 %2282, %v1348_v45  }
 0x2ff   : > { %v1225_v24 = vpop.permute.xlu1 %1224 }
 0x300   : > { %v1371_v37 = vmul.f32 %v1225_v24, %v2980_v4  ;;  %v1504_v6 = vpop.permute.xlu2 %1503  ;;  %v1369_v24 = vmul.f32 %v3083_v52, %v2980_v4 }
 0x302   : > { %1608 = vperm.xlu0 %2280, %v1367_v20  }
 0x304   : > { %v1483_v38 = vpop.permute.xlu0 %1482 }
 0x305   : > { %v1645_v17 = vperm.slane %v1483_v38, %v2774_v61 }
 0x306   : > { %1611 = vperm.xlu2 %2281, %v1368_v54   ;;  %1560 = vperm.xlu1 %2282, %v1351_v56   ;;  %v1646_v56 = vperm.slane %v1486_v3, %v2774_v61  ;;  %v1649_v3 = vperm.slane %v1495_v11, %v2774_v61 }
 0x307   : > { %v1246_v15 = vpop.permute.xlu1 %1245 }
 0x308   : > { %v1374_v18 = vmul.f32 %v1246_v15, %v2980_v4  ;;  %v1513_v63 = vpop.permute.xlu2 %1512 }
 0x30a   : > { %1617 = vperm.xlu0 %2280, %v1370_v46  }
 0x30c   : > { %v1492_v10 = vpop.permute.xlu0 %1491 }
 0x30d   : > { %v1648_v52 = vperm.slane %v1492_v10, %v2774_v61 }
 0x30e   : > { %1620 = vperm.xlu2 %2281, %v1371_v37   ;;  %1569 = vperm.xlu1 %2282, %v1354_v49   ;;  %v1372_v49 = vmul.f32 %v3094_v36, %v2980_v4 }
 0x310   : > { %v1447_v29 = vpop.permute.xlu1 %1446  ;;  %v1522_v43 = vpop.permute.xlu2 %1521 }
 0x311   : > { %v1633_v59 = vperm.slane %v1447_v29, %v2774_v61 }
 0x312   : > { %1626 = vperm.xlu0 %2280, %v1373_v16  }
 0x313   : > { %v1696_v47 = vsel %vm771_vm8, %v1633_v59, %v1695_v12 }
 0x314   : > { %v1697_v53 = vsel %vm773_vm9, %v1634_v57, %v1696_v47  ;;  %v1501_v0 = vpop.permute.xlu0 %1500 }
 0x315   : > { %v1651_v4 = vperm.slane %v1501_v0, %v2774_v61  ;;  %v1655_v0 = vperm.slane %v1513_v63, %v2774_v61 }
 0x316   : > { %1629 = vperm.xlu2 %2281, %v1374_v18   ;;  %1578 = vperm.xlu1 %2282, %v1357_v5   ;;  %v1652_v18 = vperm.slane %v1504_v6, %v2774_v61 }
 0x318   : > { %v1453_v42 = vpop.permute.xlu1 %1452  ;;  %v1531_v57 = vpop.permute.xlu2 %1530 }
 0x319   : > { %v1635_v40 = vperm.slane %v1453_v42, %v2774_v61 }
 0x31a   : > { %2283 = vset.pattern.permute.xlu0 %v2576_v1 }
 0x31b   : > { %v1699_v48 = vsel %vm1698_vm11, %v1635_v40, %v1697_v53 }
 0x31c   : > { %v1701_v14 = vsel %vm1700_vm12, %v1636_v21, %v1699_v48  ;;  %v1510_v39 = vpop.permute.xlu0 %1509 }
 0x31d   : > { %v1703_v51 = vsel %vm1702_vm13, %v1637_v27, %v1701_v14  ;;  %v1654_v10 = vperm.slane %v1510_v39, %v2774_v61 }
 0x31e   : > { %1587 = vperm.xlu1 %2282, %v1360_v25   ;;  %2285 = vset.pattern.permute.xlu2 %v2591_v13  ;;  %v1640_v13 = vperm.slane %v3123_v8, %v2774_v61 }
 0x320   : > { %v1462_v12 = vpop.permute.xlu1 %1461  ;;  %v1706_v50 = vsel %vm769_vm7, %v1640_v13, %v1639_v22  ;;  %v1540_v27 = vpop.permute.xlu2 %1539 }
 0x321   : > { %v1638_v41 = vperm.slane %v1462_v12, %v2774_v61 }
 0x323   : > { %v3159_v1 = vsel %vm1704_vm14, %v1638_v41, %v1703_v51 }
 0x324   : > { %v1519_v54 = vpop.permute.xlu0 %1518 }
 0x325   : > { %v1657_v6 = vperm.slane %v1519_v54, %v2774_v61 }
 0x326   : > { %1596 = vperm.xlu1 %2282, %v1363_v55  }
 0x328   : > { %v1471_v60 = vpop.permute.xlu1 %1470  ;;  %v1549_v51 = vpop.permute.xlu2 %1548 }
 0x329   : > { %v1641_v62 = vperm.slane %v1471_v60, %v2774_v61 }
 0x32b   : > { %v1707_v23 = vsel %vm771_vm8, %v1641_v62, %v1706_v50 }
 0x32c   : > { %v1708_v32 = vsel %vm773_vm9, %v1642_v26, %v1707_v23  ;;  %v1528_v29 = vpop.permute.xlu0 %1527 }
 0x32d   : > { %v1709_v8 = vsel %vm1698_vm11, %v1643_v19, %v1708_v32  ;;  %v1660_v39 = vperm.slane %v1528_v29, %v2774_v61  ;;  %v1764_v32 = vsel %vm1763_vm15, %v3159_v1, 0.0 }
 0x32e   : > { %1605 = vperm.xlu1 %2282, %v1366_v28   ;;  %v1658_v28 = vperm.slane %v1522_v43, %v2774_v61 }
 0x330   : > { %v1480_v58 = vpop.permute.xlu1 %1479  ;;  %v1558_v60 = vpop.permute.xlu2 %1557 }
 0x331   : > { %v1644_v45 = vperm.slane %v1480_v58, %v2774_v61 }
 0x333   : > { %v1710_v7 = vsel %vm1700_vm12, %v1644_v45, %v1709_v8  ;;  %v1661_v8 = vperm.slane %v1531_v57, %v2774_v61 }
 0x334   : > { %v1711_v20 = vsel %vm1702_vm13, %v1645_v17, %v1710_v7  ;;  %v1537_v21 = vpop.permute.xlu0 %1536  ;;  %v1664_v17 = vperm.slane %v1540_v27, %v2774_v61 }
 0x335   : > { %v1712_v15 = vsel %vm1704_vm14, %v1646_v56, %v1711_v20  ;;  %v1663_v63 = vperm.slane %v1537_v21, %v2774_v61 }
 0x336   : > { %1614 = vperm.xlu1 %2282, %v1369_v24   ;;  %v1767_v46 = vsel %vm1763_vm15, %v1712_v15, 0.0 }
 0x337   : > { %v1727_v56 = vsel %vm769_vm7, %v1664_v17, %v1663_v63 }
 0x338   : > { %v1489_v9 = vpop.permute.xlu1 %1488  ;;  %v1567_v20 = vpop.permute.xlu2 %1566 }
 0x339   : > { %v1647_v37 = vperm.slane %v1489_v9, %v2774_v61 }
 0x33b   : > { %v1713_v38 = vsel %vm769_vm7, %v1648_v52, %v1647_v37 }
 0x33c   : > { %1768 = vadd.xlane.f32.xlu0 %v1767_v46  ;;  %v1714_v47 = vsel %vm771_vm8, %v1649_v3, %v1713_v38  ;;  %v1546_v14 = vpop.permute.xlu0 %1545  ;;  %v1670_v3 = vperm.slane %v1558_v60, %v2774_v61 }
 0x33d   : > { %v1666_v9 = vperm.slane %v1546_v14, %v2774_v61 }
 0x33e   : > { %1623 = vperm.xlu1 %2282, %v1372_v49   ;;  %v1667_v49 = vperm.slane %v1549_v51, %v2774_v61 }
 0x340   : > { %v1498_v16 = vpop.permute.xlu1 %1497  ;;  %v1576_v57 = vpop.permute.xlu2 %1575 }
 0x341   : > { %v1650_v59 = vperm.slane %v1498_v16, %v2774_v61 }
 0x343   : > { %v1715_v5 = vsel %vm773_vm9, %v1650_v59, %v1714_v47 }
 0x344   : > { %v1716_v36 = vsel %vm1698_vm11, %v1651_v4, %v1715_v5  ;;  %v1555_v22 = vpop.permute.xlu0 %1554 }
 0x345   : > { %v1717_v40 = vsel %vm1700_vm12, %v1652_v18, %v1716_v36  ;;  %v1669_v38 = vperm.slane %v1555_v22, %v2774_v61 }
 0x346   : > { %2284 = vset.pattern.permute.xlu1 %v2580_v2 }
 0x348   : > { %v1507_v53 = vpop.permute.xlu1 %1506 }
 0x349   : > { %v1653_v42 = vperm.slane %v1507_v53, %v2774_v61 }
 0x34b   : > { %v1718_v11 = vsel %vm1702_vm13, %v1653_v42, %v1717_v40  ;;  %v1585_v42 = vpop.permute.xlu2 %1584 }
 0x34c   : > { %v1719_v48 = vsel %vm1704_vm14, %v1654_v10, %v1718_v11  ;;  %v1564_v7 = vpop.permute.xlu0 %1563  ;;  %v1673_v11 = vperm.slane %v1567_v20, %v2774_v61 }
 0x34d   : > { %v1770_v25 = vsel %vm1763_vm15, %v1719_v48, 0.0  ;;  %v1672_v10 = vperm.slane %v1564_v7, %v2774_v61 }
 0x34e   : > { %1771 = vadd.xlane.f32.xlu2 %v1770_v25 }
 0x350   : > { %v1516_v2 = vpop.permute.xlu1 %1515 }
 0x351   : > { %v1656_v41 = vperm.slane %v1516_v2, %v2774_v61 }
 0x353   : > { %v1720_v55 = vsel %vm769_vm7, %v1656_v41, %v1655_v0  ;;  %v1594_v41 = vpop.permute.xlu2 %1593 }
 0x354   : > { %v1721_v62 = vsel %vm771_vm8, %v1657_v6, %v1720_v55  ;;  %v1573_v29 = vpop.permute.xlu0 %1572 }
 0x355   : > { %v1722_v23 = vsel %vm773_vm9, %v1658_v28, %v1721_v62  ;;  %v1675_v2 = vperm.slane %v1573_v29, %v2774_v61 }
 0x358   : > { %v1525_v12 = vpop.permute.xlu1 %1524 }
 0x359   : > { %v1659_v50 = vperm.slane %v1525_v12, %v2774_v61  ;;  %v1676_v12 = vperm.slane %v1576_v57, %v2774_v61 }
 0x35b   : > { %v1723_v26 = vsel %vm1698_vm11, %v1659_v50, %v1722_v23 }
 0x35c   : > { %v1724_v45 = vsel %vm1700_vm12, %v1660_v39, %v1723_v26  ;;  %v1582_v53 = vpop.permute.xlu0 %1581  ;;  %v1603_v26 = vpop.permute.xlu2 %1602  ;;  %v1679_v39 = vperm.slane %v1585_v42, %v2774_v61 }
 0x35d   : > { %v1725_v54 = vsel %vm1702_vm13, %v1661_v8, %v1724_v45  ;;  %v1678_v6 = vperm.slane %v1582_v53, %v2774_v61  ;;  %v1682_v45 = vperm.slane %v1594_v41, %v2774_v61 }
 0x360   : > { %v1534_v13 = vpop.permute.xlu1 %1533 }
 0x361   : > { %v1662_v19 = vperm.slane %v1534_v13, %v2774_v61 }
 0x363   : > { %v1726_v43 = vsel %vm1704_vm14, %v1662_v19, %v1725_v54  ;;  %v2295_v54 = vld [vmem:[%s3382_s4] ss:$0 sm:$0xff] }
 0x364   : > { %v1773_v46 = vsel %vm1763_vm15, %v1726_v43, 0.0  ;;  %v1591_v14 = vpop.permute.xlu0 %1590  ;;  %v1685_v43 = vperm.slane %v1603_v26, %v2774_v61 }
 0x368   : > { %v1543_v58 = vpop.permute.xlu1 %1542  ;;  %1765 = vadd.xlane.f32.xlu1 %v1764_v32  ;;  %v1681_v32 = vperm.slane %v1591_v14, %v2774_v61 }
 0x369   : > { %v1665_v24 = vperm.slane %v1543_v58, %v2774_v61 }
 0x36b   : > { %v1728_v1 = vsel %vm771_vm8, %v1665_v24, %v1727_v56  ;;  %v1612_v24 = vpop.permute.xlu2 %1611 }
 0x36c   : > { %v1729_v15 = vsel %vm773_vm9, %v1666_v9, %v1728_v1  ;;  %v1600_v28 = vpop.permute.xlu0 %1599  ;;  %v1688_v29 = vperm.slane %v1612_v24, %v2774_v61 }
 0x36d   : > { %v1730_v16 = vsel %vm1698_vm11, %v1667_v49, %v1729_v15  ;;  %v1684_v56 = vperm.slane %v1600_v28, %v2774_v61 }
 0x370   : > { %v1552_v37 = vpop.permute.xlu1 %1551  ;;  %1774 = vadd.xlane.f32.xlu1 %v1773_v46 }
 0x371   : > { %v1668_v52 = vperm.slane %v1552_v37, %v2774_v61 }
 0x373   : > { %v1731_v59 = vsel %vm1700_vm12, %v1668_v52, %v1730_v16 }
 0x374   : > { %v1732_v47 = vsel %vm1702_vm13, %v1669_v38, %v1731_v59  ;;  %v1609_v17 = vpop.permute.xlu0 %1608  ;;  %v1621_v38 = vpop.permute.xlu2 %1620 }
 0x375   : > { %v1733_v5 = vsel %vm1704_vm14, %v1670_v3, %v1732_v47  ;;  %v1687_v16 = vperm.slane %v1609_v17, %v2774_v61 }
 0x376   : > { %v1776_v4 = vsel %vm1763_vm15, %v1733_v5, 0.0 }
 0x377   : > { %1777 = vadd.xlane.f32.xlu2 %v1776_v4  ;;  %v1748_v57 = vsel %vm769_vm7, %v1688_v29, %v1687_v16 }
 0x378   : > { %v1561_v36 = vpop.permute.xlu1 %1560 }
 0x379   : > { %v1671_v18 = vperm.slane %v1561_v36, %v2774_v61 }
 0x37b   : > { %v1734_v40 = vsel %vm769_vm7, %v1672_v10, %v1671_v18  ;;  %v1691_v18 = vperm.slane %v1621_v38, %v2774_v61 }
 0x37c   : > { %v1735_v48 = vsel %vm771_vm8, %v1673_v11, %v1734_v40  ;;  %v1618_v52 = vpop.permute.xlu0 %1617  ;;  %v1630_v53 = vpop.permute.xlu2 %1629 }
 0x37d   : > { %v1690_v5 = vperm.slane %v1618_v52, %v2774_v61 }
 0x380   : > { %v1570_v21 = vpop.permute.xlu1 %1569 }
 0x381   : > { %v1674_v27 = vperm.slane %v1570_v21, %v2774_v61 }
 0x383   : > { %v1736_v25 = vsel %vm773_vm9, %v1674_v27, %v1735_v48 }
 0x384   : > { %v1737_v51 = vsel %vm1698_vm11, %v1675_v2, %v1736_v25  ;;  %v1627_v4 = vpop.permute.xlu0 %1626 }
 0x385   : > { %v1738_v22 = vsel %vm1700_vm12, %v1676_v12, %v1737_v51  ;;  %v1693_v40 = vperm.slane %v1627_v4, %v2774_v61 }
 0x388   : > { %v1579_v0 = vpop.permute.xlu1 %1578 }
 0x389   : > { %v1677_v55 = vperm.slane %v1579_v0, %v2774_v61 }
 0x38b   : > { %v1739_v60 = vsel %vm1702_vm13, %v1677_v55, %v1738_v22 }
 0x38c   : > { %v1740_v13 = vsel %vm1704_vm14, %v1678_v6, %v1739_v60 }
 0x38d   : > { %v1779_v62 = vsel %vm1763_vm15, %v1740_v13, 0.0 }
 0x38e   : > { %1780 = vadd.xlane.f32.xlu0 %v1779_v62 }
 0x390   : > { %v1588_v50 = vpop.permute.xlu1 %1587 }
 0x391   : > { %v1680_v23 = vperm.slane %v1588_v50, %v2774_v61 }
 0x393   : > { %v1741_v63 = vsel %vm769_vm7, %v1680_v23, %v1679_v39 }
 0x394   : > { %v1742_v19 = vsel %vm771_vm8, %v1681_v32, %v1741_v63 }
 0x395   : > { %v1743_v7 = vsel %vm773_vm9, %v1682_v45, %v1742_v19 }
 0x398   : > { %v1597_v58 = vpop.permute.xlu1 %1596 }
 0x399   : > { %v1683_v8 = vperm.slane %v1597_v58, %v2774_v61 }
 0x39b   : > { %v1744_v20 = vsel %vm1698_vm11, %v1683_v8, %v1743_v7 }
 0x39c   : > { %v1745_v1 = vsel %vm1700_vm12, %v1684_v56, %v1744_v20 }
 0x39d   : > { %v1746_v46 = vsel %vm1702_vm13, %v1685_v43, %v1745_v1 }
 0x3a0   : > { %v1606_v9 = vpop.permute.xlu1 %1605 }
 0x3a1   : > { %v1686_v15 = vperm.slane %v1606_v9, %v2774_v61 }
 0x3a2   : > { %1794 = vperm.xlu0 %2283, %v2295_v54  }
 0x3a3   : > { %v1747_v49 = vsel %vm1704_vm14, %v1686_v15, %v1746_v46 }
 0x3a4   : > { %v1782_v37 = vsel %vm1763_vm15, %v1747_v49, 0.0 }
 0x3a5   : > { %1783 = vadd.xlane.f32.xlu1 %v1782_v37 }
 0x3a8   : > { %v1615_v3 = vpop.permute.xlu1 %1614 }
 0x3a9   : > { %v1689_v59 = vperm.slane %v1615_v3, %v2774_v61 }
 0x3aa   : > { %2290 = vset.pattern.permute.xlu0 %v2621_v34  ;;  %v1694_v34 = vperm.slane %v1630_v53, %v2774_v61 }
 0x3ab   : > { %v1749_v47 = vsel %vm771_vm8, %v1689_v59, %v1748_v57 }
 0x3ac   : > { %v1750_v36 = vsel %vm773_vm9, %v1690_v5, %v1749_v47 }
 0x3ad   : > { %v1751_v21 = vsel %vm1698_vm11, %v1691_v18, %v1750_v36 }
 0x3b0   : > { %v1624_v42 = vpop.permute.xlu1 %1623 }
 0x3b1   : > { %v1692_v10 = vperm.slane %v1624_v42, %v2774_v61  ;;  %v1769_v61 = vpop.xlane.xlu0 %1768 }
 0x3b2   : > { %1836 = vperm.xlu0 %2290, %v2295_v54  }
 0x3b3   : > { %v1752_v11 = vsel %vm1700_vm12, %v1692_v10, %v1751_v21 }
 0x3b4   : > { %v1753_v27 = vsel %vm1702_vm13, %v1693_v40, %v1752_v11 }
 0x3b5   : > { %v1754_v48 = vsel %vm1704_vm14, %v1694_v34, %v1753_v27 }
 0x3b6   : > { %v1785_v25 = vsel %vm1763_vm15, %v1754_v48, 0.0 }
 0x3b7   : > { %1786 = vadd.xlane.f32.xlu2 %v1785_v25 }
 0x3ba   : > { %2293 = vset.pattern.permute.xlu0 %v2444_v44 }
 0x3be   : > { %1800 = vperm.xlu1 %2284, %v2295_v54  }
 0x3c6   : > { %2286 = vset.pattern.permute.xlu1 %v2607_v30 }
 0x3ce   : > { %1812 = vperm.xlu1 %2286, %v2295_v54  }
 0x3cf   : > { %1806 = vperm.xlu2 %2285, %v2295_v54  }
 0x3d6   : > { %2288 = vset.pattern.permute.xlu1 %v2612_v31  ;;  %v1772_v31 = vpop.xlane.xlu2 %1771 }
 0x3d7   : > { %2287 = vset.pattern.permute.xlu2 %v2616_v33 }
 0x3db   : > { %v1766_v14 = vpop.xlane.xlu1 %1765 }
 0x3de   : > { %1824 = vperm.xlu1 %2288, %v2295_v54  }
 0x3df   : > { %1818 = vperm.xlu2 %2287, %v2295_v54  }
 0x3e3   : > { %v1775_v33 = vpop.xlane.xlu1 %1774 }
 0x3e6   : > { %2291 = vset.pattern.permute.xlu1 %v2444_v44 }
 0x3e7   : > { %2289 = vset.pattern.permute.xlu2 %v2625_v35 }
 0x3ea   : > { %v1778_v55 = vpop.xlane.xlu2 %1777 }
 0x3ef   : > { %1830 = vperm.xlu2 %2289, %v2295_v54  }
 0x3f7   : > { %2292 = vset.pattern.permute.xlu2 %v2444_v44 }
 0x401   : > { %v3298_v2 = vpop.xlane.xlu0 %1780 }
 0x414   : > { %v1795_v30 = vpop.permute.xlu0 %1794 }
 0x415   : > { %v1846_v51 = vadd.f32 %v1795_v30, %v1766_v14 }
 0x417   : > { %v2176_v12 = vmul.f32 -1.442695, %v1846_v51 }
 0x418   : > { %v1784_v22 = vpop.xlane.xlu1 %1783 }
 0x419   : > { %2296 = vpow2.f32 %v2176_v12 }
 0x41f   : > { %v2297_v41 = vpop.eup %2296 }
 0x420   : > { %v1878_v0 = vadd.f32 1.0, %v2297_v41 }
 0x422   : > { %2298 = vrcp.f32 %v1878_v0  ;;  %v1897_v44 = vand.u32 2147483648, %v1878_v0  ;;  %v1895_v50 = vand.u32 2147483647, %v1878_v0  ;;  %vm1891_vm1 = vweird.f32 %v1878_v0 }
 0x424   : > { %v1898_v26 = vor.u32 1.1754944e-38, %v1897_v44  ;;  %vm1896_vm3 = vcmp.eq.f32.partialorder %v1895_v50, 8.507059e+37  ;;  %v1837_v9 = vpop.permute.xlu0 %1836 }
 0x428   : > { %v2299_v6 = vpop.eup %2298 }
 0x429   : > { %v1887_v35 = vmul.f32 %v2299_v6, %v1878_v0  ;;  %vm1892_vm0 = vweird.f32 %v2299_v6 }
 0x42a   : > { %v1787_v60 = vpop.xlane.xlu2 %1786  ;;  %vm1893_vm2 = vmor %vm1891_vm1, %vm1892_vm0 }
 0x42b   : > { %v1888_v13 = vsub.f32 1.0, %v1887_v35  ;;  %v1853_v37 = vadd.f32 %v1837_v9, %v1787_v60 }
 0x42d   : > { %v1889_v62 = vmul.f32 %v2299_v6, %v1888_v13  ;;  %v2183_v57 = vmul.f32 -1.442695, %v1853_v37 }
 0x42f   : > { %v1890_v28 = vadd.f32 %v2299_v6, %v1889_v62 }
 0x430   : > { %v1801_v23 = vpop.permute.xlu1 %1800 }
 0x431   : > { %v1847_v39 = vadd.f32 %v1801_v23, %v1769_v61  ;;  %v1894_v63 = vsel %vm1893_vm2, %v2299_v6, %v1890_v28 }
 0x432   : > { %v1807_v32 = vpop.permute.xlu2 %1806  ;;  %v1899_v19 = vsel %vm1896_vm3, %v1898_v26, %v1894_v63 }
 0x433   : > { %v2177_v58 = vmul.f32 -1.442695, %v1847_v39  ;;  %v1848_v45 = vadd.f32 %v1807_v32, %v1772_v31  ;;  %2008 = vperm.xlu1 %2291, %v1899_v19  }
 0x435   : > { %2300 = vpow2.f32 %v2177_v58  ;;  %v2178_v8 = vmul.f32 -1.442695, %v1848_v45 }
 0x437   : > { %2302 = vpow2.f32 %v2178_v8 }
 0x43a   : > { %v1819_v17 = vpop.permute.xlu2 %1818 }
 0x43b   : > { %v2301_v7 = vpop.eup %2300  ;;  %v1850_v24 = vadd.f32 %v1819_v17, %v1778_v55 }
 0x43c   : > { %v1879_v20 = vadd.f32 1.0, %v2301_v7 }
 0x43d   : > { %v2303_v56 = vpop.eup %2302  ;;  %v2180_v54 = vmul.f32 -1.442695, %v1850_v24 }
 0x43e   : > { %2304 = vrcp.f32 %v1879_v20  ;;  %v1880_v1 = vadd.f32 1.0, %v2303_v56  ;;  %v1912_v47 = vand.u32 2147483648, %v1879_v20  ;;  %v1910_v36 = vand.u32 2147483647, %v1879_v20 }
 0x43f   : > { %2306 = vpow2.f32 %v2180_v54  ;;  %vm1906_vm5 = vweird.f32 %v1879_v20 }
 0x440   : > { %2308 = vrcp.f32 %v1880_v1  ;;  %v1813_v43 = vpop.permute.xlu1 %1812  ;;  %v1927_v42 = vand.u32 2147483648, %v1880_v1  ;;  %v1925_v34 = vand.u32 2147483647, %v1880_v1  ;;  %v1913_v48 = vor.u32 1.1754944e-38, %v1912_v47 }
 0x441   : > { %v1849_v15 = vadd.f32 %v1813_v43, %v1775_v33  ;;  %vm1911_vm8 = vcmp.eq.f32.partialorder %v1910_v36, 8.507059e+37  ;;  %vm1921_vm9 = vweird.f32 %v1880_v1 }
 0x442   : > { %v1928_v51 = vor.u32 1.1754944e-38, %v1927_v42  ;;  %vm1926_vm11 = vcmp.eq.f32.partialorder %v1925_v34, 8.507059e+37 }
 0x443   : > { %v2179_v46 = vmul.f32 -1.442695, %v1849_v15 }
 0x444   : > { %v2305_v49 = vpop.eup %2304 }
 0x445   : > { %v2307_v52 = vpop.eup %2306  ;;  %2310 = vpow2.f32 %v2179_v46  ;;  %v1902_v38 = vmul.f32 %v2305_v49, %v1879_v20  ;;  %vm1907_vm4 = vweird.f32 %v2305_v49 }
 0x446   : > { %v2309_v16 = vpop.eup %2308  ;;  %v1882_v3 = vadd.f32 1.0, %v2307_v52  ;;  %vm1908_vm7 = vmor %vm1906_vm5, %vm1907_vm4 }
 0x447   : > { %v1903_v29 = vsub.f32 1.0, %v1902_v38  ;;  %v1917_v59 = vmul.f32 %v2309_v16, %v1880_v1  ;;  %vm1922_vm6 = vweird.f32 %v2309_v16 }
 0x448   : > { %2312 = vrcp.f32 %v1882_v3  ;;  %vm1923_vm10 = vmor %vm1921_vm9, %vm1922_vm6  ;;  %v1955_v13 = vand.u32 2147483647, %v1882_v3  ;;  %vm1951_vm13 = vweird.f32 %v1882_v3 }
 0x449   : > { %v1831_v5 = vpop.permute.xlu2 %1830  ;;  %v1904_v4 = vmul.f32 %v2305_v49, %v1903_v29  ;;  %v1918_v18 = vsub.f32 1.0, %v1917_v59  ;;  %2314 = vpow2.f32 %v2183_v57 }
 0x44a   : > { %v1852_v53 = vadd.f32 %v1831_v5, %v1784_v22  ;;  %v1957_v22 = vand.u32 2147483648, %v1882_v3  ;;  %vm1956_vm15 = vcmp.eq.f32.partialorder %v1955_v13, 8.507059e+37 }
 0x44b   : > { %v2311_v10 = vpop.eup %2310  ;;  %v1905_v40 = vadd.f32 %v2305_v49, %v1904_v4  ;;  %v1919_v21 = vmul.f32 %v2309_v16, %v1918_v18 }
 0x44c   : > { %v1881_v11 = vadd.f32 1.0, %v2311_v10  ;;  %v2182_v27 = vmul.f32 -1.442695, %v1852_v53  ;;  %v1958_v39 = vor.u32 1.1754944e-38, %v1957_v22  ;;  %v2332_v22 = vld [vmem:[%s2569_s25 + $0x30] sm:$0xff] }
 0x44d   : > { %v1909_v25 = vsel %vm1908_vm7, %v2305_v49, %v1905_v40  ;;  %v1920_v61 = vadd.f32 %v2309_v16, %v1919_v21 }
 0x44e   : > { %v2313_v14 = vpop.eup %2312  ;;  %2316 = vrcp.f32 %v1881_v11  ;;  %v1914_v30 = vsel %vm1911_vm8, %v1913_v48, %v1909_v25  ;;  %v1942_v19 = vand.u32 2147483648, %v1881_v11  ;;  %v1940_v45 = vand.u32 2147483647, %v1881_v11 }
 0x44f   : > { %2318 = vpow2.f32 %v2182_v27  ;;  %2013 = vperm.xlu2 %2292, %v1914_v30   ;;  %v1924_v12 = vsel %vm1923_vm10, %v2309_v16, %v1920_v61  ;;  %v1947_v31 = vmul.f32 %v2313_v14, %v1882_v3  ;;  %v2315_v6 = vpop.eup %2314  ;;  %vm1952_vm12 = vweird.f32 %v2313_v14 }
 0x450   : > { %v1825_v41 = vpop.permute.xlu1 %1824  ;;  %v1929_v33 = vsel %vm1926_vm11, %v1928_v51, %v1924_v12  ;;  %v3301_v23 = vadd.f32 1.0, %v2315_v6  ;;  %vm1953_vm14 = vmor %vm1951_vm13, %vm1952_vm12  ;;  %vm1936_vm1 = vweird.f32 %v1881_v11  ;;  %v1943_v24 = vor.u32 1.1754944e-38, %v1942_v19  ;;  %v2329_v51 = vld [vmem:[%s2569_s25 + $0x8] sm:$0xff] }
 0x451   : > { %v1851_v0 = vadd.f32 %v1825_v41, %v3298_v2  ;;  %2018 = vperm.xlu1 %2291, %v1929_v33   ;;  %v1948_v55 = vsub.f32 1.0, %v1947_v31  ;;  %vm1941_vm3 = vcmp.eq.f32.partialorder %v1940_v45, 8.507059e+37  ;;  %v2330_v41 = vld [vmem:[%s2569_s25 + $0x10] sm:$0xff] }
 0x452   : > { %v2002_v34 = vand.u32 2147483648, %v3301_v23  ;;  %vm1996_vm13 = vweird.f32 %v3301_v23 }
 0x453   : > { %v2181_v35 = vmul.f32 -1.442695, %v1851_v0  ;;  %v1949_v60 = vmul.f32 %v2313_v14, %v1948_v55  ;;  %v2331_v0 = vld [vmem:[%s2569_s25 + $0x18] sm:$0xff] }
 0x454   : > { %v2317_v44 = vpop.eup %2316  ;;  %v2003_v48 = vor.u32 1.1754944e-38, %v2002_v34 }
 0x455   : > { %v2319_v62 = vpop.eup %2318  ;;  %2320 = vpow2.f32 %v2181_v35  ;;  %v1950_v50 = vadd.f32 %v2313_v14, %v1949_v60  ;;  %v1932_v28 = vmul.f32 %v2317_v44, %v1881_v11  ;;  %vm1937_vm0 = vweird.f32 %v2317_v44  ;;  %v2333_v60 = vld [vmem:[%s2569_s25 + $0x38] sm:$0xff] }
 0x456   : > { %v1884_v26 = vadd.f32 1.0, %v2319_v62  ;;  %vm1938_vm2 = vmor %vm1936_vm1, %vm1937_vm0  ;;  %v2000_v11 = vand.u32 2147483647, %v3301_v23 }
 0x457   : > { %v1954_v2 = vsel %vm1953_vm14, %v2313_v14, %v1950_v50  ;;  %v1933_v63 = vsub.f32 1.0, %v1932_v28  ;;  %v2328_v14 = vld [vmem:[%s2569_s25] sm:$0xff] }
 0x458   : > { %2322 = vrcp.f32 %v1884_v26  ;;  %v1959_v32 = vsel %vm1956_vm15, %v1958_v39, %v1954_v2  ;;  %v1987_v15 = vand.u32 2147483648, %v1884_v26  ;;  %v1985_v49 = vand.u32 2147483647, %v1884_v26  ;;  %v2334_v50 = vld [vmem:[%s2569_s25 + $0x60] sm:$0xff] }
 0x459   : > { %2028 = vperm.xlu0 %2293, %v1959_v32   ;;  %v1934_v58 = vmul.f32 %v2317_v44, %v1933_v63  ;;  %2324 = vrcp.f32 %v3301_v23  ;;  %vm1981_vm5 = vweird.f32 %v1884_v26  ;;  %vm2001_vm15 = vcmp.eq.f32.partialorder %v2000_v11, 8.507059e+37  ;;  %v2336_v39 = vld [vmem:[%s2569_s25 + $0x20] sm:$0xff]  ;;  %v2337_v63 = vld [vmem:[%s2569_s25 + $0x28] sm:$0xff] }
 0x45a   : > { %v1988_v3 = vor.u32 1.1754944e-38, %v1987_v15  ;;  %vm1986_vm7 = vcmp.eq.f32.partialorder %v1985_v49, 8.507059e+37  ;;  %v2343_v15 = vld [vmem:[%s2569_s25 + $0x78] sm:$0xff] }
 0x45b   : > { %v2321_v8 = vpop.eup %2320  ;;  %v1935_v17 = vadd.f32 %v2317_v44, %v1934_v58  ;;  %v2338_v58 = vld [vmem:[%s2569_s25 + $0x40] sm:$0xff] }
 0x45c   : > { %v1883_v7 = vadd.f32 1.0, %v2321_v8  ;;  %v2339_v8 = vld [vmem:[%s2569_s25 + $0x48] sm:$0xff] }
 0x45d   : > { %v1939_v20 = vsel %vm1938_vm2, %v2317_v44, %v1935_v17 }
 0x45e   : > { %v2323_v56 = vpop.eup %2322  ;;  %2326 = vrcp.f32 %v1883_v7  ;;  %v1944_v54 = vsel %vm1941_vm3, %v1943_v24, %v1939_v20  ;;  %v1972_v5 = vand.u32 2147483648, %v1883_v7  ;;  %v1970_v36 = vand.u32 2147483647, %v1883_v7  ;;  %v2340_v24 = vld [vmem:[%s2569_s25 + $0x50] sm:$0xff] }
 0x45f   : > { %2023 = vperm.xlu2 %2292, %v1944_v54   ;;  %v1977_v1 = vmul.f32 %v2323_v56, %v1884_v26  ;;  %v2325_v43 = vpop.eup %2324  ;;  %vm1982_vm4 = vweird.f32 %v2323_v56  ;;  %vm1966_vm9 = vweird.f32 %v1883_v7 }
 0x460   : > { %v1992_v37 = vmul.f32 %v2325_v43, %v3301_v23  ;;  %vm1983_vm6 = vmor %vm1981_vm5, %vm1982_vm4  ;;  %v1973_v42 = vor.u32 1.1754944e-38, %v1972_v5  ;;  %vm1971_vm11 = vcmp.eq.f32.partialorder %v1970_v36, 8.507059e+37  ;;  %vm1997_vm12 = vweird.f32 %v2325_v43  ;;  %v2335_v23 = vld [vmem:[%s2569_s25 + $0x68] sm:$0xff] }
 0x461   : > { %v1978_v9 = vsub.f32 1.0, %v1977_v1  ;;  %vm1998_vm14 = vmor %vm1996_vm13, %vm1997_vm12 }
 0x462   : > { %v1993_v57 = vsub.f32 1.0, %v1992_v37 }
 0x463   : > { %v1979_v46 = vmul.f32 %v2323_v56, %v1978_v9 }
 0x464   : > { %v2327_v52 = vpop.eup %2326  ;;  %v1994_v53 = vmul.f32 %v2325_v43, %v1993_v57 }
 0x465   : > { %v1980_v38 = vadd.f32 %v2323_v56, %v1979_v46  ;;  %v1962_v16 = vmul.f32 %v2327_v52, %v1883_v7  ;;  %vm1967_vm8 = vweird.f32 %v2327_v52 }
 0x466   : > { %vm1968_vm10 = vmor %vm1966_vm9, %vm1967_vm8  ;;  %v1995_v21 = vadd.f32 %v2325_v43, %v1994_v53 }
 0x467   : > { %v1984_v29 = vsel %vm1983_vm6, %v2323_v56, %v1980_v38  ;;  %v1963_v59 = vsub.f32 1.0, %v1962_v16  ;;  %v2341_v56 = vld [vmem:[%s2569_s25 + $0x58] sm:$0xff] }
 0x468   : > { %v1989_v47 = vsel %vm1986_vm7, %v1988_v3, %v1984_v29  ;;  %v1999_v27 = vsel %vm1998_vm14, %v2325_v43, %v1995_v21  ;;  %v2342_v43 = vld [vmem:[%s2569_s25 + $0x70] sm:$0xff] }
 0x469   : > { %2038 = vperm.xlu2 %2292, %v1989_v47   ;;  %v1964_v4 = vmul.f32 %v2327_v52, %v1963_v59  ;;  %v2004_v25 = vsel %vm2001_vm15, %v2003_v48, %v1999_v27 }
 0x46b   : > { %v1965_v18 = vadd.f32 %v2327_v52, %v1964_v4 }
 0x46d   : > { %v1969_v10 = vsel %vm1968_vm10, %v2327_v52, %v1965_v18 }
 0x46e   : > { %v1974_v40 = vsel %vm1971_vm11, %v1973_v42, %v1969_v10 }
 0x46f   : > { %2033 = vperm.xlu1 %2291, %v1974_v40  }
 0x477   : > { %2043 = vperm.xlu1 %2291, %v2004_v25  }
 0x4a5   : > { %v2009_v61 = vpop.permute.xlu1 %2008 }
 0x4a6   : > { %v2046_v30 = vmul.f32 %v2328_v14, %v2009_v61  ;;  %v2047_v12 = vmul.f32 %v2329_v51, %v2009_v61 }
 0x4a8   : > { %2062 = vst [vmem:[%s3312_s10] sm:$0xff] %v2046_v30 }
 0x4a9   : > { %2063 = vst [vmem:[%s3312_s10 + $0x8] sm:$0xff] %v2047_v12  ;;  %v2014_v31 = vpop.permute.xlu2 %2013 }
 0x4aa   : > { %v2048_v33 = vmul.f32 %v2330_v41, %v2014_v31  ;;  %v2049_v55 = vmul.f32 %v2331_v0, %v2014_v31 }
 0x4ac   : > { %2064 = vst [vmem:[%s3312_s10 + $0x10] sm:$0xff] %v2048_v33 }
 0x4ad   : > { %2065 = vst [vmem:[%s3312_s10 + $0x18] sm:$0xff] %v2049_v55 }
 0x4b9   : > { %v2024_v6 = vpop.permute.xlu2 %2023 }
 0x4ba   : > { %v2052_v35 = vmul.f32 %v2332_v22, %v2024_v6  ;;  %v2053_v13 = vmul.f32 %v2333_v60, %v2024_v6 }
 0x4bc   : > { %2068 = vst [vmem:[%s3312_s10 + $0x30] sm:$0xff] %v2052_v35 }
 0x4bd   : > { %2069 = vst [vmem:[%s3312_s10 + $0x38] sm:$0xff] %v2053_v13 }
 0x4c3   : > { %v2039_v44 = vpop.permute.xlu2 %2038  ;;  %v2019_v62 = vpop.permute.xlu1 %2018 }
 0x4c4   : > { %v2058_v28 = vmul.f32 %v2334_v50, %v2039_v44  ;;  %v2059_v26 = vmul.f32 %v2335_v23, %v2039_v44  ;;  %v2050_v2 = vmul.f32 %v2336_v39, %v2019_v62  ;;  %v2051_v32 = vmul.f32 %v2337_v63, %v2019_v62 }
 0x4c6   : > { %2074 = vst [vmem:[%s3312_s10 + $0x60] sm:$0xff] %v2058_v28 }
 0x4c7   : > { %2075 = vst [vmem:[%s3312_s10 + $0x68] sm:$0xff] %v2059_v26 }
 0x4c8   : > { %2066 = vst [vmem:[%s3312_s10 + $0x20] sm:$0xff] %v2050_v2 }
 0x4c9   : > { %2067 = vst [vmem:[%s3312_s10 + $0x28] sm:$0xff] %v2051_v32 }
 0x4cb   : > { %v2029_v19 = vpop.permute.xlu0 %2028 }
 0x4cc   : > { %v2054_v45 = vmul.f32 %v2338_v58, %v2029_v19  ;;  %v2055_v17 = vmul.f32 %v2339_v8, %v2029_v19 }
 0x4ce   : > { %2070 = vst [vmem:[%s3312_s10 + $0x40] sm:$0xff] %v2054_v45 }
 0x4cf   : > { %2071 = vst [vmem:[%s3312_s10 + $0x48] sm:$0xff] %v2055_v17 }
 0x4e1   : > { %v2034_v7 = vpop.permute.xlu1 %2033 }
 0x4e2   : > { %v2056_v20 = vmul.f32 %v2340_v24, %v2034_v7  ;;  %v2057_v54 = vmul.f32 %v2341_v56, %v2034_v7 }
 0x4e4   : > { %2072 = vst [vmem:[%s3312_s10 + $0x50] sm:$0xff] %v2056_v20 }
 0x4e5   : > { %2073 = vst [vmem:[%s3312_s10 + $0x58] sm:$0xff] %v2057_v54 }
 0x4e9   : > { %v2044_v1 = vpop.permute.xlu1 %2043 }
 0x4ea   : > { %v2060_v9 = vmul.f32 %v2342_v43, %v2044_v1  ;;  %v2061_v46 = vmul.f32 %v2343_v15, %v2044_v1 }
 0x4ec   : > { %2076 = vst [vmem:[%s3312_s10 + $0x70] sm:$0xff] %v2060_v9 }
 0x4ed   : > { %2077 = vst [vmem:[%s3312_s10 + $0x78] sm:$0xff] %v2061_v46 }
 0x4ee   : > { %2401 = shalt.err (!%p2398_p4)
}
 0x4ef   : > { %s2445_s12 = smov 256   ;;  %s2446_s25 = smov 16  }
 0x4f0   : > { %2193 = dma.vmem_to_hbm [thread:$0]  (%p2527_p11), %s2092_s29, 2048, %s2094_s13, %s2079_s22, %s2445_s12, %s2445_s12, %s2446_s25  }
 0x4f1 PF: > { %s2108_s10 = sand.u32 1, %s2428_s18   ;;  %p3389_p7 = scmp.ge.s32.totalorder %s2440_s21, 2 }
 0x4f2   : > { %s2109_s14 = scalar_lea.sflag [#allocation4], %s2108_s10 }
 0x4f3   : > { %p2200_p5 = pnand %p3389_p7, %p2531_p12 }
 0x4f5   : > { %p2201_p8 = pneg %p2200_p5 }
 0x4f7   : > { %2423 = dma.done.wait (%p2201_p8), %s2109_s14, 2048  }
 0x4f8   : > { %2425 = vsyncadd (%p2201_p8), %s2109_s14, 4294965248  ;;  %p18_p10 = scmp.ge.s32.totalorder %s2502_s24, 4   ;;  %s3390_s18 = smov %s2432_s19 }
 0x4f9   : > { %s3391_s19 = smov %s2436_s20  ;;  %s3392_s20 = smov %s2514_s27 }
 0x4fa   : > { %s3393_s21 = smov %s2502_s24  ;;  %20 = sbr.rel (!%p18_p10) target bundleno = 5 (0x5), region = 85 }
 0x4ff   :  { %2115 = vsyncpa [#allocation3], 1 }
 0x500   :  { %2117 = vsyncpa [#allocation3 + $0x1], 1 }
 0x501   :  { %2118 = vsyncpa [#allocation4], 1 }
 0x502   :  { %2120 = vsyncpa [#allocation4 + $0x1], 1 }

</bundles_post_ra>
